<compile_context>
chip_gen: v7x
topology: tpu7x:2x2x1
jax: 0.10.0
libtpu: 0.0.40
codegen_flags: <defaults>
</compile_context>

<pallas_src>
import functools

import jax
import jax.numpy as jnp
import numpy as np
from jax import lax
from jax.experimental import pallas as pl
from jax.experimental.pallas import tpu as pltpu

NEG_SLOPE = 0.2   # LeakyReLU negative_slope
EPS = 1e-5        # InstanceNorm2d eps


# ----------------------------------------------------------------------------
# Fused kernel: concat -> conv3x3 -> IN -> LReLU -> conv3x3 -> IN -> LReLU
# One grid step processes one batch element; everything stays in VMEM.
# ----------------------------------------------------------------------------
def _upconv_fused_kernel(x1_ref, x2_ref, mask_ref, wf1_ref, wf2_ref, o_ref,
                         xpad1, patches1, xpad2, patches2, *, H, W, img0):
    # Layout: channels on sublanes, flattened spatial (H*W) on lanes.
    #   x1_ref   (1, C1, H*W)          f32   full-res skip input
    #   x2_ref   (1, C2, H*W)          bf16  upsampled input
    #   mask_ref (3, H*W)              f32   column-validity mask per horiz. tap
    #   wf1_ref  (Cout, 9*(C1+C2))     bf16  conv1 weights, col = tap*Cin + cin
    #   wf2_ref  (Cout, 9*Cout)        bf16  conv2 weights
    #   o_ref    (1, Cout, H*W)        f32
    #   xpad*    (C, img0+H*W+W+1)     f32   zero-haloed flat image scratch
    #   patches* (9*C, H*W)            f32   im2col scratch
    HW = H * W
    C1 = x1_ref.shape[1]
    Cin = xpad1.shape[0]
    Cout = o_ref.shape[1]

    def conv_in_lrelu(xpad_ref, patches_ref, wf_ref, cin):
        # im2col: tap (dh, dw) of output pixel p = h*W + w reads the haloed flat
        # buffer at img0 + p + (dh-1)*W + (dw-1).  Out-of-range rows land in the
        # zero halo; out-of-range columns are zeroed by the dw mask.
        for dh in range(3):
            for dw in range(3):
                t = dh * 3 + dw
                s = img0 + (dh - 1) * W + (dw - 1)
                sl = xpad_ref[:, s:s + HW]                       # (cin, HW) f32
                if dw != 1:                                      # edge columns
                    sl = sl * mask_ref[dw:dw + 1, :]
                patches_ref[t * cin:(t + 1) * cin, :] = sl
        # Single MXU matmul per conv block: (Cout, 9*cin) @ (9*cin, HW),
        # bf16 operands, f32 accumulation.
        acc = jnp.dot(wf_ref[...], patches_ref[...].astype(jnp.bfloat16),
                      preferred_element_type=jnp.float32)        # (Cout, HW) f32
        # InstanceNorm2d (affine=False, biased variance), single-pass stats,
        # lane (spatial) reduction.  Conv bias is omitted: it cancels here.
        inv_n = 1.0 / HW
        mean = jnp.sum(acc, axis=1, keepdims=True) * inv_n
        var = jnp.sum(acc * acc, axis=1, keepdims=True) * inv_n - mean * mean
        y = (acc - mean) * lax.rsqrt(var + EPS)
        # LeakyReLU(0.2)
        return jnp.where(y >= 0, y, NEG_SLOPE * y)

    # Zero halos, then drop this batch element's channels in (concat fused here).
    xpad1[...] = jnp.zeros_like(xpad1)
    xpad1[:C1, img0:img0 + HW] = x1_ref[0]
    xpad1[C1:, img0:img0 + HW] = x2_ref[0].astype(jnp.float32)
    y1 = conv_in_lrelu(xpad1, patches1, wf1_ref, Cin)            # (Cout, HW) f32

    # conv2 input never leaves VMEM.
    xpad2[...] = jnp.zeros_like(xpad2)
    xpad2[:, img0:img0 + HW] = y1
    y2 = conv_in_lrelu(xpad2, patches2, wf2_ref, Cout)

    o_ref[0] = y2


# ----------------------------------------------------------------------------
# Glue: bilinear x2 upsample, align_corners=True (== nn.UpsamplingBilinear2d),
# operating directly in NCHW.
# ----------------------------------------------------------------------------
def upsample_bilinear_x2_align_corners_nchw(x):  # (N, C, H, W) -> (N, C, 2H, 2W)
    N, C, H, W = x.shape
    Ho, Wo = 2 * H, 2 * W

    def coords(n_in, n_out):
        src = jnp.arange(n_out, dtype=jnp.float32) * (n_in - 1) / (n_out - 1)
        i0 = jnp.clip(jnp.floor(src).astype(jnp.int32), 0, n_in - 1)
        i1 = jnp.clip(i0 + 1, 0, n_in - 1)
        return i0, i1, src - i0.astype(jnp.float32)

    hi0, hi1, hf = coords(H, Ho)
    wi0, wi1, wf = coords(W, Wo)
    rows = (x[:, :, hi0, :] * (1.0 - hf)[None, None, :, None]
            + x[:, :, hi1, :] * hf[None, None, :, None])
    return (rows[:, :, :, wi0] * (1.0 - wf)[None, None, None, :]
            + rows[:, :, :, wi1] * wf[None, None, None, :])


def _flatten_w(w_hwio):
    # (3, 3, Cin, Cout) HWIO -> (Cout, 9*Cin); column index = (dh*3+dw)*Cin + cin
    _, _, ci, co = w_hwio.shape
    return jnp.transpose(w_hwio.reshape(9, ci, co), (2, 0, 1)).reshape(co, 9 * ci)


# ----------------------------------------------------------------------------
# UpConv forward (NCHW in / NCHW out, matching the PyTorch module)
# ----------------------------------------------------------------------------
def upconv_forward(x1_nchw, x2_nchw, w1_hwio, b1, w2_hwio, b2):
    # b1/b2 accepted for interface parity but unused: a conv bias followed by
    # affine=False InstanceNorm2d is cancelled exactly by the mean subtraction.
    del b1, b2
    N, C1, H, W = x1_nchw.shape
    C2 = x2_nchw.shape[1]
    Cin = C1 + C2
    Cout = w1_hwio.shape[-1]
    HW = H * W
    img0 = ((W + 1 + 127) // 128) * 128   # lane-aligned image start in halo buffer
    HWP = img0 + HW + W + 1

    x2_up = upsample_bilinear_x2_align_corners_nchw(x2_nchw.astype(jnp.float32))

    # Free reshapes (contiguous): NCHW -> (N, C, H*W).  The upsampled tensor is
    # materialized in bf16 (cast fuses into the upsample), halving its HBM read.
    x1_flat = x1_nchw.astype(jnp.float32).reshape(N, C1, HW)
    x2_flat = x2_up.astype(jnp.bfloat16).reshape(N, C2, HW)

    wf1 = _flatten_w(w1_hwio.astype(jnp.float32)).astype(jnp.bfloat16)
    wf2 = _flatten_w(w2_hwio.astype(jnp.float32)).astype(jnp.bfloat16)

    # Column-validity masks for the three horizontal taps (dw = 0, 1, 2).
    wcol = jnp.arange(HW, dtype=jnp.int32) % W
    masks = jnp.stack(
        [((wcol + dw - 1 >= 0) & (wcol + dw - 1 < W)) for dw in range(3)],
        axis=0).astype(jnp.float32)                               # (3, HW)

    kernel = functools.partial(_upconv_fused_kernel, H=H, W=W, img0=img0)

    flops = 2 * N * HW * 9 * (Cin * Cout + Cout * Cout)
    bytes_accessed = (x1_flat.size * 4 + x2_flat.size * 2 + masks.size * 4
                      + wf1.size * 2 + wf2.size * 2 + N * Cout * HW * 4)

    out = pl.pallas_call(
        kernel,
        out_shape=jax.ShapeDtypeStruct((N, Cout, HW), jnp.float32),
        grid_spec=pltpu.PrefetchScalarGridSpec(
            num_scalar_prefetch=0,
            grid=(N,),
            in_specs=[
                pl.BlockSpec((1, C1, HW), lambda b: (b, 0, 0)),
                pl.BlockSpec((1, C2, HW), lambda b: (b, 0, 0)),
                pl.BlockSpec((3, HW), lambda b: (0, 0)),
                pl.BlockSpec((Cout, 9 * Cin), lambda b: (0, 0)),
                pl.BlockSpec((Cout, 9 * Cout), lambda b: (0, 0)),
            ],
            out_specs=pl.BlockSpec((1, Cout, HW), lambda b: (b, 0, 0)),
            scratch_shapes=[
                pltpu.VMEM((Cin, HWP), jnp.float32),       # haloed conv1 input
                pltpu.VMEM((9 * Cin, HW), jnp.float32),    # conv1 im2col
                pltpu.VMEM((Cout, HWP), jnp.float32),      # haloed conv2 input
                pltpu.VMEM((9 * Cout, HW), jnp.float32),   # conv2 im2col
            ],
        ),
        compiler_params=pltpu.CompilerParams(
            dimension_semantics=("parallel",),
            vmem_limit_bytes=48 * 1024 * 1024,
        ),
        cost_estimate=pl.CostEstimate(
            flops=flops, transcendentals=2 * N * Cout,
            bytes_accessed=bytes_accessed),
    )(x1_flat, x2_flat, masks, wf1, wf2)

    # Output is already (N, Cout, H*W): reshape (free) back to NCHW.
    return out.reshape(N, Cout, H, W)


# ----------------------------------------------------------------------------
# Pure-JAX reference (NCHW throughout).  Conv inputs/weights are rounded to
# bf16 to mirror the kernel's bf16 MXU operands (accumulation stays f32), so a
# tight 2e-3 tolerance genuinely checks the kernel logic.
# ----------------------------------------------------------------------------
def _q_bf16(x):
    return x.astype(jnp.bfloat16).astype(jnp.float32)


def _ref_block(x_nchw, w_hwio, b):
    y = lax.conv_general_dilated(
        _q_bf16(x_nchw), _q_bf16(w_hwio), window_strides=(1, 1),
        padding=((1, 1), (1, 1)),
        dimension_numbers=("NCHW", "HWIO", "NCHW"),
        preferred_element_type=jnp.float32)
    y = y + b[None, :, None, None]   # bias kept here: cancelled by the norm
    mean = jnp.mean(y, axis=(2, 3), keepdims=True)
    var = jnp.mean((y - mean) ** 2, axis=(2, 3), keepdims=True)
    y = (y - mean) / jnp.sqrt(var + EPS)
    return jnp.where(y >= 0, y, NEG_SLOPE * y)


def upconv_reference(x1_nchw, x2_nchw, w1, b1, w2, b2):
    x = jnp.concatenate(
        [x1_nchw.astype(jnp.float32),
         upsample_bilinear_x2_align_corners_nchw(x2_nchw.astype(jnp.float32))],
        axis=1)
    y = _ref_block(x, w1, b1)
    y = _ref_block(y, w2, b2)
    return y


if __name__ == "__main__":
    key = jax.random.PRNGKey(0)
    k1, k2, k3, k4, k5, k6 = jax.random.split(key, 6)

    # inputs1 at full res, inputs2 at half res; conv1 in_size = C1 + C2.
    N, C1, H, W = 2, 4, 16, 16
    C2 = 4
    in_size = C1 + C2
    out_size = 8

    x1 = jax.random.normal(k1, (N, C1, H, W), jnp.float32)
    x2 = jax.random.normal(k2, (N, C2, H // 2, W // 2), jnp.float32)

    # Deterministic PyTorch-style uniform fan-in init, HWIO layout.
    bound1 = 1.0 / float(np.sqrt(in_size * 9))
    w1 = jax.random.uniform(k3, (3, 3, in_size, out_size), jnp.float32, -bound1, bound1)
    b1 = jax.random.uniform(k4, (out_size,), jnp.float32, -bound1, bound1)
    bound2 = 1.0 / float(np.sqrt(out_size * 9))
    w2 = jax.random.uniform(k5, (3, 3, out_size, out_size), jnp.float32, -bound2, bound2)
    b2 = jax.random.uniform(k6, (out_size,), jnp.float32, -bound2, bound2)

    out = jax.block_until_ready(upconv_forward(x1, x2, w1, b1, w2, b2))
    ref = jax.block_until_ready(upconv_reference(x1, x2, w1, b1, w2, b2))

    np.testing.assert_allclose(np.asarray(out), np.asarray(ref), atol=2e-3, rtol=2e-3)
    print("KERNEL_OK")
</pallas_src>

<mosaic_0001>
module attributes {stable_mosaic.version = 11 : i64} {
  func.func @_upconv_fused_kernel(%arg0: i32, %arg1: memref<1x4x256xf32, #tpu.memory_space<vmem>>, %arg2: memref<1x4x256xbf16, #tpu.memory_space<vmem>>, %arg3: memref<3x256xf32, #tpu.memory_space<vmem>>, %arg4: memref<8x72xbf16, #tpu.memory_space<vmem>>, %arg5: memref<8x72xbf16, #tpu.memory_space<vmem>>, %arg6: memref<1x8x256xf32, #tpu.memory_space<vmem>>, %arg7: memref<8x401xf32, #tpu.memory_space<vmem>>, %arg8: memref<72x256xf32, #tpu.memory_space<vmem>>, %arg9: memref<8x401xf32, #tpu.memory_space<vmem>>, %arg10: memref<72x256xf32, #tpu.memory_space<vmem>>) attributes {dimension_semantics = [#tpu.dimension_semantics<parallel>], iteration_bounds = array<i64: 2>, scalar_prefetch = 0 : i64, scratch_operands = 4 : i64, tpu.core_type = #tpu.core_type<tc>, window_params = [{transform_indices = @transform_0, window_bounds = array<i64: 1, 4, 256>}, {transform_indices = @transform_1, window_bounds = array<i64: 1, 4, 256>}, {pipeline_mode = #tpu.pipeline_mode<synchronous>, transform_indices = @transform_2, window_bounds = array<i64: 3, 256>}, {pipeline_mode = #tpu.pipeline_mode<synchronous>, transform_indices = @transform_3, window_bounds = array<i64: 8, 72>}, {pipeline_mode = #tpu.pipeline_mode<synchronous>, transform_indices = @transform_4, window_bounds = array<i64: 8, 72>}, {transform_indices = @transform_5, window_bounds = array<i64: 1, 8, 256>}]} {
    %cst = arith.constant 0.000000e+00 : f32
    %0 = vector.broadcast %cst : f32 to vector<8x401xf32>
    %c0 = arith.constant 0 : index
    %c0_0 = arith.constant 0 : index
    %1 = vector.load %arg7[%c0, %c0_0] : memref<8x401xf32, #tpu.memory_space<vmem>>, vector<8x401xf32>
    tpu.vector_store %arg7[%c0, %c0_0], %0 {strides = array<i32>} : memref<8x401xf32, #tpu.memory_space<vmem>>, vector<8x401xf32>,
    %c0_1 = arith.constant 0 : index
    %c0_2 = arith.constant 0 : index
    %c0_3 = arith.constant 0 : index
    %2 = vector.load %arg1[%c0_1, %c0_2, %c0_3] : memref<1x4x256xf32, #tpu.memory_space<vmem>>, vector<1x4x256xf32>
    %3 = vector.shape_cast %2 : vector<1x4x256xf32> to vector<4x256xf32>
    %c0_4 = arith.constant 0 : index
    %c128 = arith.constant 128 : index
    %4 = vector.load %arg7[%c0_4, %c128] : memref<8x401xf32, #tpu.memory_space<vmem>>, vector<4x256xf32>
    tpu.vector_store %arg7[%c0_4, %c128], %3 {strides = array<i32>} : memref<8x401xf32, #tpu.memory_space<vmem>>, vector<4x256xf32>,
    %c0_5 = arith.constant 0 : index
    %c0_6 = arith.constant 0 : index
    %c0_7 = arith.constant 0 : index
    %5 = vector.load %arg2[%c0_5, %c0_6, %c0_7] : memref<1x4x256xbf16, #tpu.memory_space<vmem>>, vector<1x4x256xbf16>
    %6 = vector.shape_cast %5 : vector<1x4x256xbf16> to vector<4x256xbf16>
    %7 = arith.extf %6 : vector<4x256xbf16> to vector<4x256xf32>
    %c4 = arith.constant 4 : index
    %c128_8 = arith.constant 128 : index
    %8 = vector.load %arg7[%c4, %c128_8] : memref<8x401xf32, #tpu.memory_space<vmem>>, vector<4x256xf32>
    tpu.vector_store %arg7[%c4, %c128_8], %7 {strides = array<i32>} : memref<8x401xf32, #tpu.memory_space<vmem>>, vector<4x256xf32>,
    %c0_9 = arith.constant 0 : index
    %c111 = arith.constant 111 : index
    %9 = vector.load %arg7[%c0_9, %c111] : memref<8x401xf32, #tpu.memory_space<vmem>>, vector<8x256xf32>
    %c0_10 = arith.constant 0 : index
    %c0_11 = arith.constant 0 : index
    %10 = vector.load %arg3[%c0_10, %c0_11] : memref<3x256xf32, #tpu.memory_space<vmem>>, vector<1x256xf32>
    %11 = vector.broadcast %10 : vector<1x256xf32> to vector<8x256xf32>
    %12 = arith.mulf %9, %11 : vector<8x256xf32>
    %c0_12 = arith.constant 0 : index
    %c0_13 = arith.constant 0 : index
    %13 = vector.load %arg8[%c0_12, %c0_13] : memref<72x256xf32, #tpu.memory_space<vmem>>, vector<8x256xf32>
    tpu.vector_store %arg8[%c0_12, %c0_13], %12 {strides = array<i32>} : memref<72x256xf32, #tpu.memory_space<vmem>>, vector<8x256xf32>,
    %c0_14 = arith.constant 0 : index
    %c112 = arith.constant 112 : index
    %14 = vector.load %arg7[%c0_14, %c112] : memref<8x401xf32, #tpu.memory_space<vmem>>, vector<8x256xf32>
    %c8 = arith.constant 8 : index
    %c0_15 = arith.constant 0 : index
    %15 = vector.load %arg8[%c8, %c0_15] : memref<72x256xf32, #tpu.memory_space<vmem>>, vector<8x256xf32>
    tpu.vector_store %arg8[%c8, %c0_15], %14 {strides = array<i32>} : memref<72x256xf32, #tpu.memory_space<vmem>>, vector<8x256xf32>,
    %c0_16 = arith.constant 0 : index
    %c113 = arith.constant 113 : index
    %16 = vector.load %arg7[%c0_16, %c113] : memref<8x401xf32, #tpu.memory_space<vmem>>, vector<8x256xf32>
    %c2 = arith.constant 2 : index
    %c0_17 = arith.constant 0 : index
    %17 = vector.load %arg3[%c2, %c0_17] : memref<3x256xf32, #tpu.memory_space<vmem>>, vector<1x256xf32>
    %18 = vector.broadcast %17 : vector<1x256xf32> to vector<8x256xf32>
    %19 = arith.mulf %16, %18 : vector<8x256xf32>
    %c16 = arith.constant 16 : index
    %c0_18 = arith.constant 0 : index
    %20 = vector.load %arg8[%c16, %c0_18] : memref<72x256xf32, #tpu.memory_space<vmem>>, vector<8x256xf32>
    tpu.vector_store %arg8[%c16, %c0_18], %19 {strides = array<i32>} : memref<72x256xf32, #tpu.memory_space<vmem>>, vector<8x256xf32>,
    %c0_19 = arith.constant 0 : index
    %c127 = arith.constant 127 : index
    %21 = vector.load %arg7[%c0_19, %c127] : memref<8x401xf32, #tpu.memory_space<vmem>>, vector<8x256xf32>
    %c0_20 = arith.constant 0 : index
    %c0_21 = arith.constant 0 : index
    %22 = vector.load %arg3[%c0_20, %c0_21] : memref<3x256xf32, #tpu.memory_space<vmem>>, vector<1x256xf32>
    %23 = vector.broadcast %22 : vector<1x256xf32> to vector<8x256xf32>
    %24 = arith.mulf %21, %23 : vector<8x256xf32>
    %c24 = arith.constant 24 : index
    %c0_22 = arith.constant 0 : index
    %25 = vector.load %arg8[%c24, %c0_22] : memref<72x256xf32, #tpu.memory_space<vmem>>, vector<8x256xf32>
    tpu.vector_store %arg8[%c24, %c0_22], %24 {strides = array<i32>} : memref<72x256xf32, #tpu.memory_space<vmem>>, vector<8x256xf32>,
    %c0_23 = arith.constant 0 : index
    %c128_24 = arith.constant 128 : index
    %26 = vector.load %arg7[%c0_23, %c128_24] : memref<8x401xf32, #tpu.memory_space<vmem>>, vector<8x256xf32>
    %c32 = arith.constant 32 : index
    %c0_25 = arith.constant 0 : index
    %27 = vector.load %arg8[%c32, %c0_25] : memref<72x256xf32, #tpu.memory_space<vmem>>, vector<8x256xf32>
    tpu.vector_store %arg8[%c32, %c0_25], %26 {strides = array<i32>} : memref<72x256xf32, #tpu.memory_space<vmem>>, vector<8x256xf32>,
    %c0_26 = arith.constant 0 : index
    %c129 = arith.constant 129 : index
    %28 = vector.load %arg7[%c0_26, %c129] : memref<8x401xf32, #tpu.memory_space<vmem>>, vector<8x256xf32>
    %c2_27 = arith.constant 2 : index
    %c0_28 = arith.constant 0 : index
    %29 = vector.load %arg3[%c2_27, %c0_28] : memref<3x256xf32, #tpu.memory_space<vmem>>, vector<1x256xf32>
    %30 = vector.broadcast %29 : vector<1x256xf32> to vector<8x256xf32>
    %31 = arith.mulf %28, %30 : vector<8x256xf32>
    %c40 = arith.constant 40 : index
    %c0_29 = arith.constant 0 : index
    %32 = vector.load %arg8[%c40, %c0_29] : memref<72x256xf32, #tpu.memory_space<vmem>>, vector<8x256xf32>
    tpu.vector_store %arg8[%c40, %c0_29], %31 {strides = array<i32>} : memref<72x256xf32, #tpu.memory_space<vmem>>, vector<8x256xf32>,
    %c0_30 = arith.constant 0 : index
    %c143 = arith.constant 143 : index
    %33 = vector.load %arg7[%c0_30, %c143] : memref<8x401xf32, #tpu.memory_space<vmem>>, vector<8x256xf32>
    %c0_31 = arith.constant 0 : index
    %c0_32 = arith.constant 0 : index
    %34 = vector.load %arg3[%c0_31, %c0_32] : memref<3x256xf32, #tpu.memory_space<vmem>>, vector<1x256xf32>
    %35 = vector.broadcast %34 : vector<1x256xf32> to vector<8x256xf32>
    %36 = arith.mulf %33, %35 : vector<8x256xf32>
    %c48 = arith.constant 48 : index
    %c0_33 = arith.constant 0 : index
    %37 = vector.load %arg8[%c48, %c0_33] : memref<72x256xf32, #tpu.memory_space<vmem>>, vector<8x256xf32>
    tpu.vector_store %arg8[%c48, %c0_33], %36 {strides = array<i32>} : memref<72x256xf32, #tpu.memory_space<vmem>>, vector<8x256xf32>,
    %c0_34 = arith.constant 0 : index
    %c144 = arith.constant 144 : index
    %38 = vector.load %arg7[%c0_34, %c144] : memref<8x401xf32, #tpu.memory_space<vmem>>, vector<8x256xf32>
    %c56 = arith.constant 56 : index
    %c0_35 = arith.constant 0 : index
    %39 = vector.load %arg8[%c56, %c0_35] : memref<72x256xf32, #tpu.memory_space<vmem>>, vector<8x256xf32>
    tpu.vector_store %arg8[%c56, %c0_35], %38 {strides = array<i32>} : memref<72x256xf32, #tpu.memory_space<vmem>>, vector<8x256xf32>,
    %c0_36 = arith.constant 0 : index
    %c145 = arith.constant 145 : index
    %40 = vector.load %arg7[%c0_36, %c145] : memref<8x401xf32, #tpu.memory_space<vmem>>, vector<8x256xf32>
    %c2_37 = arith.constant 2 : index
    %c0_38 = arith.constant 0 : index
    %41 = vector.load %arg3[%c2_37, %c0_38] : memref<3x256xf32, #tpu.memory_space<vmem>>, vector<1x256xf32>
    %42 = vector.broadcast %41 : vector<1x256xf32> to vector<8x256xf32>
    %43 = arith.mulf %40, %42 : vector<8x256xf32>
    %c64 = arith.constant 64 : index
    %c0_39 = arith.constant 0 : index
    %44 = vector.load %arg8[%c64, %c0_39] : memref<72x256xf32, #tpu.memory_space<vmem>>, vector<8x256xf32>
    tpu.vector_store %arg8[%c64, %c0_39], %43 {strides = array<i32>} : memref<72x256xf32, #tpu.memory_space<vmem>>, vector<8x256xf32>,
    %c0_40 = arith.constant 0 : index
    %c0_41 = arith.constant 0 : index
    %45 = vector.load %arg4[%c0_40, %c0_41] : memref<8x72xbf16, #tpu.memory_space<vmem>>, vector<8x72xbf16>
    %c0_42 = arith.constant 0 : index
    %c0_43 = arith.constant 0 : index
    %46 = vector.load %arg8[%c0_42, %c0_43] : memref<72x256xf32, #tpu.memory_space<vmem>>, vector<72x256xf32>
    %47 = arith.truncf %46 : vector<72x256xf32> to vector<72x256xbf16>
    %cst_44 = arith.constant dense<0.000000e+00> : vector<8x256xf32>
    %48 = tpu.matmul %45, %47, %cst_44 {dimension_numbers = #tpu.dot_dimension_numbers<[1], [0], [0], [1], [0, 0, 1, 1], [], []>} : vector<8x72xbf16>, vector<72x256xbf16>, vector<8x256xf32> -> vector<8x256xf32>
    %cst_45 = arith.constant dense<0.000000e+00> : vector<8xf32>
    %49 = vector.multi_reduction <add>, %48, %cst_45 [1] : vector<8x256xf32> to vector<8xf32>
    %50 = vector.shape_cast %49 : vector<8xf32> to vector<8x1xf32>
    %cst_46 = arith.constant 3.906250e-03 : f32
    %51 = vector.broadcast %cst_46 : f32 to vector<8x1xf32>
    %52 = arith.mulf %50, %51 : vector<8x1xf32>
    %53 = arith.mulf %48, %48 : vector<8x256xf32>
    %cst_47 = arith.constant dense<0.000000e+00> : vector<8xf32>
    %54 = vector.multi_reduction <add>, %53, %cst_47 [1] : vector<8x256xf32> to vector<8xf32>
    %55 = vector.shape_cast %54 : vector<8xf32> to vector<8x1xf32>
    %cst_48 = arith.constant 3.906250e-03 : f32
    %56 = vector.broadcast %cst_48 : f32 to vector<8x1xf32>
    %57 = arith.mulf %55, %56 : vector<8x1xf32>
    %58 = arith.mulf %52, %52 : vector<8x1xf32>
    %59 = arith.subf %57, %58 : vector<8x1xf32>
    %60 = vector.broadcast %52 : vector<8x1xf32> to vector<8x256xf32>
    %61 = arith.subf %48, %60 : vector<8x256xf32>
    %cst_49 = arith.constant 9.99999974E-6 : f32
    %62 = vector.broadcast %cst_49 : f32 to vector<8x1xf32>
    %63 = arith.addf %59, %62 : vector<8x1xf32>
    %64 = math.rsqrt %63 : vector<8x1xf32>
    %65 = vector.broadcast %64 : vector<8x1xf32> to vector<8x256xf32>
    %66 = arith.mulf %61, %65 : vector<8x256xf32>
    %cst_50 = arith.constant 0.000000e+00 : f32
    %67 = vector.broadcast %cst_50 : f32 to vector<8x256xf32>
    %68 = arith.cmpf oge, %66, %67 : vector<8x256xf32>
    %cst_51 = arith.constant 2.000000e-01 : f32
    %69 = vector.broadcast %cst_51 : f32 to vector<8x256xf32>
    %70 = arith.mulf %69, %66 : vector<8x256xf32>
    %71 = arith.select %68, %66, %70 : vector<8x256xi1>, vector<8x256xf32>
    %cst_52 = arith.constant 0.000000e+00 : f32
    %72 = vector.broadcast %cst_52 : f32 to vector<8x401xf32>
    %c0_53 = arith.constant 0 : index
    %c0_54 = arith.constant 0 : index
    %73 = vector.load %arg9[%c0_53, %c0_54] : memref<8x401xf32, #tpu.memory_space<vmem>>, vector<8x401xf32>
    tpu.vector_store %arg9[%c0_53, %c0_54], %72 {strides = array<i32>} : memref<8x401xf32, #tpu.memory_space<vmem>>, vector<8x401xf32>,
    %c0_55 = arith.constant 0 : index
    %c128_56 = arith.constant 128 : index
    %74 = vector.load %arg9[%c0_55, %c128_56] : memref<8x401xf32, #tpu.memory_space<vmem>>, vector<8x256xf32>
    tpu.vector_store %arg9[%c0_55, %c128_56], %71 {strides = array<i32>} : memref<8x401xf32, #tpu.memory_space<vmem>>, vector<8x256xf32>,
    %c0_57 = arith.constant 0 : index
    %c111_58 = arith.constant 111 : index
    %75 = vector.load %arg9[%c0_57, %c111_58] : memref<8x401xf32, #tpu.memory_space<vmem>>, vector<8x256xf32>
    %c0_59 = arith.constant 0 : index
    %c0_60 = arith.constant 0 : index
    %76 = vector.load %arg3[%c0_59, %c0_60] : memref<3x256xf32, #tpu.memory_space<vmem>>, vector<1x256xf32>
    %77 = vector.broadcast %76 : vector<1x256xf32> to vector<8x256xf32>
    %78 = arith.mulf %75, %77 : vector<8x256xf32>
    %c0_61 = arith.constant 0 : index
    %c0_62 = arith.constant 0 : index
    %79 = vector.load %arg10[%c0_61, %c0_62] : memref<72x256xf32, #tpu.memory_space<vmem>>, vector<8x256xf32>
    tpu.vector_store %arg10[%c0_61, %c0_62], %78 {strides = array<i32>} : memref<72x256xf32, #tpu.memory_space<vmem>>, vector<8x256xf32>,
    %c0_63 = arith.constant 0 : index
    %c112_64 = arith.constant 112 : index
    %80 = vector.load %arg9[%c0_63, %c112_64] : memref<8x401xf32, #tpu.memory_space<vmem>>, vector<8x256xf32>
    %c8_65 = arith.constant 8 : index
    %c0_66 = arith.constant 0 : index
    %81 = vector.load %arg10[%c8_65, %c0_66] : memref<72x256xf32, #tpu.memory_space<vmem>>, vector<8x256xf32>
    tpu.vector_store %arg10[%c8_65, %c0_66], %80 {strides = array<i32>} : memref<72x256xf32, #tpu.memory_space<vmem>>, vector<8x256xf32>,
    %c0_67 = arith.constant 0 : index
    %c113_68 = arith.constant 113 : index
    %82 = vector.load %arg9[%c0_67, %c113_68] : memref<8x401xf32, #tpu.memory_space<vmem>>, vector<8x256xf32>
    %c2_69 = arith.constant 2 : index
    %c0_70 = arith.constant 0 : index
    %83 = vector.load %arg3[%c2_69, %c0_70] : memref<3x256xf32, #tpu.memory_space<vmem>>, vector<1x256xf32>
    %84 = vector.broadcast %83 : vector<1x256xf32> to vector<8x256xf32>
    %85 = arith.mulf %82, %84 : vector<8x256xf32>
    %c16_71 = arith.constant 16 : index
    %c0_72 = arith.constant 0 : index
    %86 = vector.load %arg10[%c16_71, %c0_72] : memref<72x256xf32, #tpu.memory_space<vmem>>, vector<8x256xf32>
    tpu.vector_store %arg10[%c16_71, %c0_72], %85 {strides = array<i32>} : memref<72x256xf32, #tpu.memory_space<vmem>>, vector<8x256xf32>,
    %c0_73 = arith.constant 0 : index
    %c127_74 = arith.constant 127 : index
    %87 = vector.load %arg9[%c0_73, %c127_74] : memref<8x401xf32, #tpu.memory_space<vmem>>, vector<8x256xf32>
    %c0_75 = arith.constant 0 : index
    %c0_76 = arith.constant 0 : index
    %88 = vector.load %arg3[%c0_75, %c0_76] : memref<3x256xf32, #tpu.memory_space<vmem>>, vector<1x256xf32>
    %89 = vector.broadcast %88 : vector<1x256xf32> to vector<8x256xf32>
    %90 = arith.mulf %87, %89 : vector<8x256xf32>
    %c24_77 = arith.constant 24 : index
    %c0_78 = arith.constant 0 : index
    %91 = vector.load %arg10[%c24_77, %c0_78] : memref<72x256xf32, #tpu.memory_space<vmem>>, vector<8x256xf32>
    tpu.vector_store %arg10[%c24_77, %c0_78], %90 {strides = array<i32>} : memref<72x256xf32, #tpu.memory_space<vmem>>, vector<8x256xf32>,
    %c0_79 = arith.constant 0 : index
    %c128_80 = arith.constant 128 : index
    %92 = vector.load %arg9[%c0_79, %c128_80] : memref<8x401xf32, #tpu.memory_space<vmem>>, vector<8x256xf32>
    %c32_81 = arith.constant 32 : index
    %c0_82 = arith.constant 0 : index
    %93 = vector.load %arg10[%c32_81, %c0_82] : memref<72x256xf32, #tpu.memory_space<vmem>>, vector<8x256xf32>
    tpu.vector_store %arg10[%c32_81, %c0_82], %92 {strides = array<i32>} : memref<72x256xf32, #tpu.memory_space<vmem>>, vector<8x256xf32>,
    %c0_83 = arith.constant 0 : index
    %c129_84 = arith.constant 129 : index
    %94 = vector.load %arg9[%c0_83, %c129_84] : memref<8x401xf32, #tpu.memory_space<vmem>>, vector<8x256xf32>
    %c2_85 = arith.constant 2 : index
    %c0_86 = arith.constant 0 : index
    %95 = vector.load %arg3[%c2_85, %c0_86] : memref<3x256xf32, #tpu.memory_space<vmem>>, vector<1x256xf32>
    %96 = vector.broadcast %95 : vector<1x256xf32> to vector<8x256xf32>
    %97 = arith.mulf %94, %96 : vector<8x256xf32>
    %c40_87 = arith.constant 40 : index
    %c0_88 = arith.constant 0 : index
    %98 = vector.load %arg10[%c40_87, %c0_88] : memref<72x256xf32, #tpu.memory_space<vmem>>, vector<8x256xf32>
    tpu.vector_store %arg10[%c40_87, %c0_88], %97 {strides = array<i32>} : memref<72x256xf32, #tpu.memory_space<vmem>>, vector<8x256xf32>,
    %c0_89 = arith.constant 0 : index
    %c143_90 = arith.constant 143 : index
    %99 = vector.load %arg9[%c0_89, %c143_90] : memref<8x401xf32, #tpu.memory_space<vmem>>, vector<8x256xf32>
    %c0_91 = arith.constant 0 : index
    %c0_92 = arith.constant 0 : index
    %100 = vector.load %arg3[%c0_91, %c0_92] : memref<3x256xf32, #tpu.memory_space<vmem>>, vector<1x256xf32>
    %101 = vector.broadcast %100 : vector<1x256xf32> to vector<8x256xf32>
    %102 = arith.mulf %99, %101 : vector<8x256xf32>
    %c48_93 = arith.constant 48 : index
    %c0_94 = arith.constant 0 : index
    %103 = vector.load %arg10[%c48_93, %c0_94] : memref<72x256xf32, #tpu.memory_space<vmem>>, vector<8x256xf32>
    tpu.vector_store %arg10[%c48_93, %c0_94], %102 {strides = array<i32>} : memref<72x256xf32, #tpu.memory_space<vmem>>, vector<8x256xf32>,
    %c0_95 = arith.constant 0 : index
    %c144_96 = arith.constant 144 : index
    %104 = vector.load %arg9[%c0_95, %c144_96] : memref<8x401xf32, #tpu.memory_space<vmem>>, vector<8x256xf32>
    %c56_97 = arith.constant 56 : index
    %c0_98 = arith.constant 0 : index
    %105 = vector.load %arg10[%c56_97, %c0_98] : memref<72x256xf32, #tpu.memory_space<vmem>>, vector<8x256xf32>
    tpu.vector_store %arg10[%c56_97, %c0_98], %104 {strides = array<i32>} : memref<72x256xf32, #tpu.memory_space<vmem>>, vector<8x256xf32>,
    %c0_99 = arith.constant 0 : index
    %c145_100 = arith.constant 145 : index
    %106 = vector.load %arg9[%c0_99, %c145_100] : memref<8x401xf32, #tpu.memory_space<vmem>>, vector<8x256xf32>
    %c2_101 = arith.constant 2 : index
    %c0_102 = arith.constant 0 : index
    %107 = vector.load %arg3[%c2_101, %c0_102] : memref<3x256xf32, #tpu.memory_space<vmem>>, vector<1x256xf32>
    %108 = vector.broadcast %107 : vector<1x256xf32> to vector<8x256xf32>
    %109 = arith.mulf %106, %108 : vector<8x256xf32>
    %c64_103 = arith.constant 64 : index
    %c0_104 = arith.constant 0 : index
    %110 = vector.load %arg10[%c64_103, %c0_104] : memref<72x256xf32, #tpu.memory_space<vmem>>, vector<8x256xf32>
    tpu.vector_store %arg10[%c64_103, %c0_104], %109 {strides = array<i32>} : memref<72x256xf32, #tpu.memory_space<vmem>>, vector<8x256xf32>,
    %c0_105 = arith.constant 0 : index
    %c0_106 = arith.constant 0 : index
    %111 = vector.load %arg5[%c0_105, %c0_106] : memref<8x72xbf16, #tpu.memory_space<vmem>>, vector<8x72xbf16>
    %c0_107 = arith.constant 0 : index
    %c0_108 = arith.constant 0 : index
    %112 = vector.load %arg10[%c0_107, %c0_108] : memref<72x256xf32, #tpu.memory_space<vmem>>, vector<72x256xf32>
    %113 = arith.truncf %112 : vector<72x256xf32> to vector<72x256xbf16>
    %cst_109 = arith.constant dense<0.000000e+00> : vector<8x256xf32>
    %114 = tpu.matmul %111, %113, %cst_109 {dimension_numbers = #tpu.dot_dimension_numbers<[1], [0], [0], [1], [0, 0, 1, 1], [], []>} : vector<8x72xbf16>, vector<72x256xbf16>, vector<8x256xf32> -> vector<8x256xf32>
    %cst_110 = arith.constant dense<0.000000e+00> : vector<8xf32>
    %115 = vector.multi_reduction <add>, %114, %cst_110 [1] : vector<8x256xf32> to vector<8xf32>
    %116 = vector.shape_cast %115 : vector<8xf32> to vector<8x1xf32>
    %cst_111 = arith.constant 3.906250e-03 : f32
    %117 = vector.broadcast %cst_111 : f32 to vector<8x1xf32>
    %118 = arith.mulf %116, %117 : vector<8x1xf32>
    %119 = arith.mulf %114, %114 : vector<8x256xf32>
    %cst_112 = arith.constant dense<0.000000e+00> : vector<8xf32>
    %120 = vector.multi_reduction <add>, %119, %cst_112 [1] : vector<8x256xf32> to vector<8xf32>
    %121 = vector.shape_cast %120 : vector<8xf32> to vector<8x1xf32>
    %cst_113 = arith.constant 3.906250e-03 : f32
    %122 = vector.broadcast %cst_113 : f32 to vector<8x1xf32>
    %123 = arith.mulf %121, %122 : vector<8x1xf32>
    %124 = arith.mulf %118, %118 : vector<8x1xf32>
    %125 = arith.subf %123, %124 : vector<8x1xf32>
    %126 = vector.broadcast %118 : vector<8x1xf32> to vector<8x256xf32>
    %127 = arith.subf %114, %126 : vector<8x256xf32>
    %cst_114 = arith.constant 9.99999974E-6 : f32
    %128 = vector.broadcast %cst_114 : f32 to vector<8x1xf32>
    %129 = arith.addf %125, %128 : vector<8x1xf32>
    %130 = math.rsqrt %129 : vector<8x1xf32>
    %131 = vector.broadcast %130 : vector<8x1xf32> to vector<8x256xf32>
    %132 = arith.mulf %127, %131 : vector<8x256xf32>
    %cst_115 = arith.constant 0.000000e+00 : f32
    %133 = vector.broadcast %cst_115 : f32 to vector<8x256xf32>
    %134 = arith.cmpf oge, %132, %133 : vector<8x256xf32>
    %cst_116 = arith.constant 2.000000e-01 : f32
    %135 = vector.broadcast %cst_116 : f32 to vector<8x256xf32>
    %136 = arith.mulf %135, %132 : vector<8x256xf32>
    %137 = arith.select %134, %132, %136 : vector<8x256xi1>, vector<8x256xf32>
    %c0_117 = arith.constant 0 : index
    %c0_118 = arith.constant 0 : index
    %c0_119 = arith.constant 0 : index
    %138 = vector.load %arg6[%c0_117, %c0_118, %c0_119] : memref<1x8x256xf32, #tpu.memory_space<vmem>>, vector<1x8x256xf32>
    %139 = vector.shape_cast %138 : vector<1x8x256xf32> to vector<8x256xf32>
    %140 = vector.shape_cast %137 : vector<8x256xf32> to vector<1x8x256xf32>
    tpu.vector_store %arg6[%c0_117, %c0_118, %c0_119], %140 {strides = array<i32>} : memref<1x8x256xf32, #tpu.memory_space<vmem>>, vector<1x8x256xf32>,
    return
  }
  func.func @transform_0(%arg0: i32) -> (i32, i32, i32) {
    %c0_i32 = arith.constant 0 : i32
    %c0_i32_0 = arith.constant 0 : i32
    %c0_i32_1 = arith.constant 0 : i32
    return %arg0, %c0_i32, %c0_i32_0 : i32, i32, i32
  }
  func.func @transform_1(%arg0: i32) -> (i32, i32, i32) {
    %c0_i32 = arith.constant 0 : i32
    %c0_i32_0 = arith.constant 0 : i32
    %c0_i32_1 = arith.constant 0 : i32
    return %arg0, %c0_i32, %c0_i32_0 : i32, i32, i32
  }
  func.func @transform_2(%arg0: i32) -> (i32, i32) {
    %c0_i32 = arith.constant 0 : i32
    %c0_i32_0 = arith.constant 0 : i32
    %c0_i32_1 = arith.constant 0 : i32
    return %c0_i32, %c0_i32_0 : i32, i32
  }
  func.func @transform_3(%arg0: i32) -> (i32, i32) {
    %c0_i32 = arith.constant 0 : i32
    %c0_i32_0 = arith.constant 0 : i32
    %c0_i32_1 = arith.constant 0 : i32
    return %c0_i32, %c0_i32_0 : i32, i32
  }
  func.func @transform_4(%arg0: i32) -> (i32, i32) {
    %c0_i32 = arith.constant 0 : i32
    %c0_i32_0 = arith.constant 0 : i32
    %c0_i32_1 = arith.constant 0 : i32
    return %c0_i32, %c0_i32_0 : i32, i32
  }
  func.func @transform_5(%arg0: i32) -> (i32, i32, i32) {
    %c0_i32 = arith.constant 0 : i32
    %c0_i32_0 = arith.constant 0 : i32
    %c0_i32_1 = arith.constant 0 : i32
    return %arg0, %c0_i32, %c0_i32_0 : i32, i32, i32
  }
}

</mosaic_0001>

<bundles_post_ra>
// kernel: tpu_custom_call.1
= control target key start
LH: loop header
LB: loop body
LE: loop exit
PB: predicated region body
PF: predicated region fallthrough
CT: control target
= control target key end

     0   :  { %s2041_s0 = inlined_call_operand.hbm [shape: f32[2,4,256], index: 0, kind: input, shape index: {}]   ;;  %s2042_s1 = inlined_call_operand.hbm [shape: bf16[2,4,256], index: 1, kind: input, shape index: {}]   ;;  %s2043_s2 = inlined_call_operand.hbm [shape: f32[3,256], index: 2, kind: input, shape index: {}]   ;;  %s2044_s3 = inlined_call_operand.vmem [shape: bf16[8,72], index: 3, kind: input, shape index: {}]   ;;  %s2045_s4 = inlined_call_operand.vmem [shape: bf16[8,72], index: 4, kind: input, shape index: {}]   ;;  %s2046_s5 = inlined_call_operand.hbm [shape: f32[2,8,256], index: 5, kind: output, shape index: {}]  }
   0x1   :  { %2051 = sst [smem:[#allocation17_spill]] %s2041_s0 }
   0x2   :  { %10 = vsyncpa [#allocation7], 0 }
   0x3   :  { %12 = vsyncpa [#allocation7 + $0x1], 0 }
   0x4   :  { %13 = vsyncpa [#allocation10], 0 }
   0x5   :  { %15 = vsyncpa [#allocation10 + $0x1], 0 }
   0x6   :  { %16 = vsyncpa [#allocation8], 0 }
   0x7   :  { %18 = vsyncpa [#allocation8 + $0x1], 0  ;;  %s1591_s18 = smov 0   ;;  %s1593_s19 = smov 0  }
   0x8   :  { %s1595_s20 = smov 0   ;;  %s1597_s21 = smov 0  }
   0x9 LB: > { %s1612_s22 = sadd.s32 4294967295, %s1545_s21   ;;  %s1199_s23 = sadd.s32 4294967294, %s1545_s21   ;;  %s1545_s21 = sphi %s1597_s21, %s2073_s21   ;;  %s1541_s20 = sphi %s1595_s20, %s2072_s20   ;;  %s1537_s19 = sphi %s1593_s19, %s2071_s19   ;;  %s1533_s18 = sphi %s1591_s18, %s2070_s18  }
   0xa   : > { %s1616_s24 = sadd.s32 1, %s1545_s21   ;;  %s31_s25 = sadd.s32 1, %s1541_s20 }
   0xb   : > { %s28_s26 = ssub.s32 %s1545_s21, %s1616_s24  ;;  %p38_p0 = scmp.ne.s32.totalorder %s1541_s20, %s1537_s19 }
   0xc   : > { %p29_p1 = scmp.eq.s32.totalorder %s28_s26, 0  ;;  %p44_p2 = scmp.ne.s32.totalorder %s1537_s19, %s1533_s18 }
   0xd   : > { %p2047_p3 = scmp.eq.s32.totalorder %s1612_s22, 0  ;;  %p157_p4 = scmp.eq.s32.totalorder %s1612_s22, 1 }
   0xe   : > { %s1628_s27 = scalar_select %p29_p1, %s1541_s20, %s31_s25  }
   0xf   : > { %p1632_p5 = por %p2047_p3, %p44_p2  ;;  %p1639_p6 = por %p157_p4, %p38_p0 }
  0x10   : > { %p163_p7 = scmp.eq.s32.totalorder %s1199_s23, 1  ;;  %p1200_p8 = scmp.ge.s32.totalorder %s1545_s21, 1 }
  0x11   : > { %s2052_s28 = scalar_select %p1632_p5, 1, 0 }
  0x12   : > { %s2053_s29 = scalar_select %p1639_p6, 1, 0 }
  0x13   : > { %p170_p9 = scmp.lt.s32.totalorder %s1545_s21, 3  ;;  %p1645_p10 = por %p163_p7, %p44_p2 }
  0x14   : > { %s1547_s7 = smov [#allocation11]   ;;  %p39_p1 = scmp.eq.s32.totalorder %s1545_s21, 0 }
  0x15   : > { %s2054_s30 = scalar_select %p1645_p10, 1, 0 }
  0x16   : > { %p1649_p11 = pnand %p1200_p8, %p170_p9  ;;  %s183_s8 = sshll.u32 %s1547_s7, 4  ;;  %s184_s8 = int_to_ptr.vmem [resolvable:$true] %s183_s8 }
  0x17   : > { %s1659_s9 = sand.u32 1, %s1541_s20   ;;  %p1670_p7 = por %p39_p1, %p38_p0 }
  0x18   : > { %s2055_s6 = scalar_select %p1649_p11, 1, 0 }
  0x19   : > { %p1236_p13 = pneg %p1649_p11  ;;  %s1203_s12 = sshll.u32 %s1659_s9, 3 }
  0x1a   : > { %s2057_s11 = scalar_select %p1670_p7, 1, 0 }
  0x1b   : > { %p1663_p2 = pnand %p1236_p13, %p2047_p3  ;;  %s1383_s15 = scalar_lea.hbm %s2043_s2, 128 }
  0x1c   : > { %p1384_p8 = scmp.ne.s32.totalorder %s2043_s2, %s1383_s15  ;;  %p1390_p0 = scmp.lt.u32.totalorder %s1383_s15, %s2043_s2 }
  0x1d   : > { %p1385_p9 = pneg %p1663_p2 }
  0x1f   : > { %p1386_p13 = pnand %p1385_p9, %p1384_p8 }
  0x21   : > { %p1387_p12 = pneg %p1386_p13 }
  0x23   : > { %p1392_p1 = pnand %p1390_p0, %p1387_p12 }
  0x25   : > { %1395 = shalt.err (!%p1392_p1)
}
  0x26   : > { %s1396_s26 = scalar_lea.vmem %s184_s8, 128  ;;  %p1404_p6 = scmp.lt.s32.totalorder %s184_s8, %s184_s8 }
  0x27   : > { %p1397_p3 = scmp.ne.s32.totalorder %s184_s8, %s1396_s26  ;;  %p1405_p5 = scmp.lt.s32.totalorder %s1396_s26, %s1396_s26 }
  0x29   : > { %p1399_p4 = pnand %p1397_p3, %p1385_p9  ;;  %p1406_p11 = por %p1405_p5, %p1404_p6 }
  0x2b   : > { %p1400_p10 = pneg %p1399_p4 }
  0x2d   : > { %p1407_p7 = pnand %p1406_p11, %p1400_p10 }
  0x2f   : > { %1410 = shalt.err (!%p1407_p7)
}
  0x30   : > { %1239 = dma.hbm_to_vmem [thread:$0]  (!%p1663_p2), %s2043_s2, 128, %s184_s8, [#allocation10]  }
  0x31   : > { %s1223_s14 = sshll.u32 %s1545_s21, 7  ;;  %s204_s15 = scalar_lea.vmem [#allocation6], %s1203_s12 }
  0x32   : > { %s212_s16 = sshll.u32 %s204_s15, 4  ;;  %s2058_s0 = sld [smem:[#allocation17_spill]]  ;;  %s1697_s16 = int_to_ptr.vmem [resolvable:$true] %s212_s16 }
  0x33   : > { %p2059_p3 = scmp.ne.s32.totalorder %s2057_s11, 0  ;;  %p2060_p5 = scmp.lt.s32.totalorder %s1545_s21, 2 }
  0x34   : > { %s1206_s12 = sshll.u32 %s1659_s9, 2  ;;  %s201_s26 = scalar_lea.sflag [#allocation7], %s1659_s9 }
  0x35   : > { %p1703_p6 = pnand %p2060_p5, %p2059_p3 }
  0x37   : > { %p1413_p11 = pneg %p1703_p6 }
  0x38   : > { %s1695_s25 = scalar_lea.hbm %s2058_s0, %s1223_s14  ;;  %s1416_s14 = scalar_lea.hbm %s2058_s0, 256 }
  0x39   : > { %s1411_s7 = scalar_lea.hbm %s1695_s25, 128  ;;  %p1417_p2 = scmp.lt.u32.totalorder %s1695_s25, %s2058_s0 }
  0x3a   : > { %p1412_p10 = scmp.ne.s32.totalorder %s1695_s25, %s1411_s7  ;;  %p1418_p7 = scmp.lt.u32.totalorder %s1416_s14, %s1411_s7 }
  0x3b   : > { %p1420_p9 = scmp.lt.u32.totalorder %s1411_s7, %s1695_s25 }
  0x3c   : > { %p1414_p12 = pnand %p1413_p11, %p1412_p10  ;;  %p1419_p8 = por %p1418_p7, %p1417_p2 }
  0x3e   : > { %p1415_p4 = pneg %p1414_p12  ;;  %p1421_p13 = por %p1420_p9, %p1419_p8 }
  0x40   : > { %p1422_p0 = pnand %p1421_p13, %p1415_p4 }
  0x42   : > { %1425 = shalt.err (!%p1422_p0)
}
  0x43   : > { %s1426_s23 = scalar_lea.vmem %s1697_s16, 128  ;;  %s1548_s13 = smov [#allocation6]  }
  0x44   : > { %p1427_p1 = scmp.ne.s32.totalorder %s1697_s16, %s1426_s23  ;;  %s1431_s11 = sshll.u32 %s1548_s13, 4  ;;  %s1432_s11 = int_to_ptr.vmem [resolvable:$false] %s1431_s11 }
  0x45   : > { %s1433_s15 = scalar_lea.vmem %s1432_s11, 256  ;;  %p1434_p10 = scmp.lt.s32.totalorder %s1697_s16, %s1432_s11 }
  0x46   : > { %p1429_p3 = pnand %p1427_p1, %p1413_p11  ;;  %p1435_p12 = scmp.lt.s32.totalorder %s1433_s15, %s1426_s23 }
  0x48   : > { %p1430_p5 = pneg %p1429_p3  ;;  %p1436_p2 = por %p1435_p12, %p1434_p10 }
  0x4a   : > { %p1437_p7 = pnand %p1436_p2, %p1430_p5 }
  0x4c   : > { %1440 = shalt.err (!%p1437_p7)
}
  0x4d   : > { %1243 = dma.hbm_to_vmem [thread:$0]  (!%p1703_p6), %s1695_s25, 128, %s1697_s16, %s201_s26  }
  0x4e   : > { %s1224_s7 = sshll.u32 %s1545_s21, 6  ;;  %s223_s14 = scalar_lea.vmem [#allocation9], %s1206_s12 }
  0x4f   : > { %s231_s17 = sshll.u32 %s223_s14, 4  ;;  %s1741_s23 = scalar_lea.hbm %s2042_s1, %s1224_s7  ;;  %s232_s17 = int_to_ptr.vmem [resolvable:$true] %s231_s17 }
  0x50   : > { %s2062_s11 = sand.u32 1, %s1545_s21   ;;  %s1441_s0 = scalar_lea.hbm %s1741_s23, 64 }
  0x51   : > { %s220_s15 = scalar_lea.sflag [#allocation10], %s2062_s11  ;;  %p1442_p4 = scmp.ne.s32.totalorder %s1741_s23, %s1441_s0 }
  0x52   : > { %s1446_s25 = scalar_lea.hbm %s2042_s1, 128  ;;  %p1447_p13 = scmp.lt.u32.totalorder %s1741_s23, %s2042_s1 }
  0x53   : > { %p1444_p8 = pnand %p1442_p4, %p1413_p11  ;;  %p1448_p0 = scmp.lt.u32.totalorder %s1446_s25, %s1441_s0 }
  0x54   : > { %p1450_p3 = scmp.lt.u32.totalorder %s1441_s0, %s1741_s23 }
  0x55   : > { %p1445_p9 = pneg %p1444_p8  ;;  %p1449_p1 = por %p1448_p0, %p1447_p13 }
  0x57   : > { %p1451_p5 = por %p1450_p3, %p1449_p1 }
  0x59   : > { %p1452_p10 = pnand %p1451_p5, %p1445_p9 }
  0x5b   : > { %1455 = shalt.err (!%p1452_p10)
}
  0x5c   : > { %s1456_s26 = scalar_lea.vmem %s232_s17, 64  ;;  %s1549_s7 = smov [#allocation9]  }
  0x5d   : > { %p1457_p12 = scmp.ne.s32.totalorder %s232_s17, %s1456_s26  ;;  %s1461_s14 = sshll.u32 %s1549_s7, 4  ;;  %s1462_s14 = int_to_ptr.vmem [resolvable:$false] %s1461_s14 }
  0x5e   : > { %s1463_s13 = scalar_lea.vmem %s1462_s14, 128  ;;  %p1464_p4 = scmp.lt.s32.totalorder %s232_s17, %s1462_s14 }
  0x5f   : > { %p1459_p2 = pnand %p1457_p12, %p1413_p11  ;;  %p1465_p8 = scmp.lt.s32.totalorder %s1463_s13, %s1456_s26 }
  0x61   : > { %p1460_p7 = pneg %p1459_p2  ;;  %p1466_p0 = por %p1465_p8, %p1464_p4 }
  0x63   : > { %p1467_p13 = pnand %p1466_p0, %p1460_p7 }
  0x65   : > { %1470 = shalt.err (!%p1467_p13)
}
  0x66   : > { %1246 = dma.hbm_to_vmem [thread:$0]  (!%p1703_p6), %s1741_s23, 64, %s232_s17, %s220_s15  }
  0x67   : > { %p2063_p9 = scmp.ne.s32.totalorder %s2055_s6, 0 }
  0x68   : > { %s1767_s0 = sand.u32 (!%p2063_p9), 1, %s1537_s19   ;;  %p2064_p11 = scmp.ne.s32.totalorder (!%p2063_p9), %s2052_s28, 0 }
  0x69   : > { %240 = sbr.rel (%p2063_p9) target bundleno = 1320 (0x528), region = 40  ;;  %s1210_s11 = sshll.u32 (!%p2063_p9), %s1767_s0, 3 }
  0x6a   : > { %s243_s9 = scalar_lea.sflag (!%p2063_p9), [#allocation7], %s1767_s0  ;;  %s1771_s16 = scalar_lea.vmem (!%p2063_p9), [#allocation6], %s1210_s11 }
  0x70   : > { %1516 = dma.done.wait (%p2064_p11), %s243_s9, 128  }
  0x71   : > { %1518 = vsyncadd (%p2064_p11), %s243_s9, 4294967168  ;;  %s251_s6 = sand.u32 1, %s1612_s22   ;;  %s1211_s10 = sshll.u32 %s1767_s0, 2 }
  0x72   : > { %s252_s17 = scalar_lea.sflag [#allocation10], %s251_s6  ;;  %s255_s23 = scalar_lea.vmem [#allocation9], %s1211_s10 }
  0x73   : > { %1520 = dma.done.wait (%p2064_p11), %s252_s17, 64  }
  0x74   : > { %1522 = vsyncadd (%p2064_p11), %s252_s17, 4294967232  ;;  %p2065_p6 = scmp.eq.s32.totalorder %s1612_s22, 0 }
  0x76   : > { %1524 = dma.done.wait (%p2065_p6), [#allocation10], 128   ;;  %p2066_p1 = pmov %p2065_p6 }
  0x77   : > { %v315_v0 = vlaneseq  ;;  %v1550_v1 = vmov 0.0   ;;  %vm295_vm0 = vcmask 138240   ;;  %v373_v5 = vld [vmem:[#allocation11 + $0x2] ss:$4 sm:$0x3]  ;;  %s1551_s28 = smov 113  }
  0x78   : > { %1526 = vsyncadd (%p2066_p1), [#allocation10], 4294967168  ;;  %293 = vst [vmem:[#allocation2 + $0x8] sm:$0xff] %v1550_v1  ;;  %v313_v6 = vld [vmem:[#allocation11] ss:$4 sm:$0x3] }
  0x79   : > { %294 = vst [vmem:[#allocation2 + $0x10] sm:$0xff] %v1550_v1  ;;  %v316_v2 = vshrl.u32 %v315_v0, 7  ;;  %296 = vst.msk [vmem:[#allocation2 + $0x18] sm:$0xff] %vm295_vm0, %v1550_v1  ;;  %s1552_s15 = smov 111   ;;  %v297_v11 = vld [vmem:[%s1771_s16] sm:$0xff]  ;;  %s1553_s25 = smov 127  }
  0x7a   : > { %700 = vst.msk [vmem:[#allocation4 + $0x18] sm:$0xff] %vm295_vm0, %v1550_v1  ;;  %v303_v12 = vld [vmem:[%s255_s23] sm:$0xf]  ;;  %v414_v13 = vld [vmem:[#allocation11] ss:$4 sm:$0x3]  ;;  %v299_v14 = vcombine.high %v297_v11, %v297_v11 }
  0x7b   : > { %v1793_v3 = vsub.s32 0, %v316_v2  ;;  %v1795_v4 = vsub.s32 1, %v316_v2  ;;  %301 = vst [vmem:[#allocation2 + $0x8] sm:$0xf] %v297_v11  ;;  %v304_v15 = vunpack.c.l.bf16 %v303_v12  ;;  %s1554_s8 = smov 1   ;;  %s1555_s12 = smov 15  }
  0x7c   : > { %302 = vst [vmem:[#allocation2 + $0x10] sm:$0xf] %v299_v14  ;;  %v459_v19 = vld [vmem:[#allocation11 + $0x2] ss:$4 sm:$0x3]  ;;  %s1556_s26 = smov 17  }
  0x7d   : > { %v378_v7 = vrot.slane %v373_v5, %v1793_v3  ;;  %v318_v8 = vrot.slane %v313_v6, %v1793_v3  ;;  %v382_v9 = vrot.slane %v373_v5, %v1795_v4  ;;  %v322_v10 = vrot.slane %v313_v6, %v1795_v4  ;;  %309 = vst [vmem:[#allocation2 + $0x10] sm:$0xf0] %v304_v15  ;;  %v498_v22 = vld [vmem:[#allocation11] ss:$4 sm:$0x3]  ;;  %s1557_s7 = smov 16  }
  0x7e   : > { %v306_v16 = vcombine.low %v304_v15, %v304_v15  ;;  %v423_v17 = vrot.slane %v414_v13, %v1795_v4  ;;  %v419_v18 = vrot.slane %v414_v13, %v1793_v3  ;;  %v468_v20 = vrot.slane %v459_v19, %v1795_v4  ;;  %v556_v25 = vld [vmem:[#allocation11 + $0x2] ss:$4 sm:$0x3]  ;;  %s1558_s14 = smov 112   ;;  %s1213_s6 = sshll.u32 %s1767_s0, 4 }
  0x7f   : > { %383 = vrot.lane.b32.xlu1 %v378_v7, %s1551_s28  ;;  %323 = vrot.lane.b32.xlu0 %v318_v8, %s1552_s15  ;;  %v464_v21 = vrot.slane %v459_v19, %v1793_v3  ;;  %v507_v23 = vrot.slane %v498_v22, %v1795_v4  ;;  %v503_v24 = vrot.slane %v498_v22, %v1793_v3  ;;  %vm327_vm1 = vcmask 908288   ;;  %s1225_s10 = sshll.u32 %s1612_s22, 8  ;;  %s290_s17 = scalar_lea.vmem [#allocation12], %s1213_s6 }
  0x80   : > { %308 = vst [vmem:[#allocation2 + $0x8] sm:$0xf0] %v306_v16  ;;  %v565_v26 = vrot.slane %v556_v25, %v1795_v4  ;;  %v561_v27 = vrot.slane %v556_v25, %v1793_v3  ;;  %vm387_vm2 = vcmask 924672   ;;  %vm428_vm3 = vcmask 1039360   ;;  %v458_v54 = vld [vmem:[#allocation2 + $0x18] sm:$0xff]  ;;  %s1097_s23 = sshll.u32 %s290_s17, 4  ;;  %s1999_s23 = int_to_ptr.vmem [resolvable:$true] %s1097_s23 }
  0x81   : > { %vm445_vm4 = vcmask 7168   ;;  %vm404_vm5 = vcmask 121856   ;;  %v1559_v12 = vmov 0   ;;  %vm362_vm6 = vcmask 130048   ;;  %s1083_s22 = scalar_lea.sflag [#allocation8], %s1767_s0  ;;  %p2067_p5 = scmp.ne.s32.totalorder %s2053_s29, 0 }
  0x82   : > { %664 = vmatprep.mubr.bf16.mxu0 %v1559_v12  ;;  %1047 = vmatprep.mubr.bf16.mxu1 %v1559_v12  ;;  %vm546_vm7 = vcmask 916480   ;;  %vm625_vm8 = vcmask 1043456   ;;  %vm621_vm9 = vcmask 588800  }
  0x83   : > { %385 = vrot.lane.b32.xlu1 %v382_v9, %s1551_s28  ;;  %325 = vrot.lane.b32.xlu0 %v322_v10, %s1552_s15 }
  0x84   : > { %v1822_v29 = vld [vmem:[#allocation2 + $0x10] sm:$0xff] }
  0x85   : > { %v1318_v63 = vpack.i.bf16 %v458_v54, %v1822_v29 }
  0x87   : > { %426 = vrot.lane.b32.xlu1 %v423_v17, %s1553_s25  ;;  %424 = vrot.lane.b32.xlu0 %v419_v18, %s1553_s25  ;;  %v1820_v28 = vld [vmem:[#allocation2 + $0x8] sm:$0xff] }
  0x88   : > { %v1298_v30 = vpack.i.bf16 %v1822_v29, %v1820_v28 }
  0x8b   : > { %471 = vrot.lane.b32.xlu1 %v468_v20, %s1554_s8  ;;  %469 = vrot.lane.b32.xlu0 %v464_v21, %s1554_s8 }
  0x8f   : > { %510 = vrot.lane.b32.xlu1 %v507_v23, %s1555_s12  ;;  %508 = vrot.lane.b32.xlu0 %v503_v24, %s1555_s12 }
  0x93   : > { %568 = vrot.lane.b32.xlu1 %v565_v26, %s1556_s26  ;;  %566 = vrot.lane.b32.xlu0 %v561_v27, %s1556_s26 }
  0x97   : > { %1299 = vrot.lane.b32.xlu1 %v1298_v30, %s1557_s7 }
  0x9b   : > { %356 = vrot.lane.b32.xlu1 %v1550_v1, %s1557_s7 }
  0xf1   : > { %v384_v31 = vpop.permute.xlu1 %383  ;;  %v324_v32 = vpop.permute.xlu0 %323 }
  0xf2   : > { %v332_v33 = vmul.f32 0.0, %v324_v32  ;;  %v392_v34 = vmul.f32 0.0, %v384_v31 }
  0xf4   : > { %338 = vrot.lane.b32.xlu0 %v332_v33, %s1556_s26 }
  0xf5   : > { %v386_v35 = vpop.permute.xlu1 %385  ;;  %v326_v36 = vpop.permute.xlu0 %325 }
  0xf6   : > { %v328_v37 = vsel %vm327_vm1, %v324_v32, %v326_v36  ;;  %v334_v38 = vmul.f32 %v1822_v29, %v326_v36  ;;  %v388_v39 = vsel %vm387_vm2, %v384_v31, %v386_v35  ;;  %v394_v45 = vmul.f32 %v386_v35, %v1822_v29 }
  0xf7   : > { %v333_v40 = vmul.f32 %v1820_v28, %v328_v37  ;;  %v393_v44 = vmul.f32 %v388_v39, %v1820_v28 }
  0xf8   : > { %398 = vrot.lane.b32.xlu0 %v392_v34, %s1555_s12 }
  0xf9   : > { %v1303_v41 = vpack.i.bf16 %v334_v38, %v333_v40  ;;  %v427_v42 = vpop.permute.xlu1 %426  ;;  %v425_v43 = vpop.permute.xlu0 %424  ;;  %v1308_v50 = vpack.i.bf16 %v394_v45, %v393_v44 }
  0xfa   : > { %v433_v46 = vmul.f32 0.0, %v425_v43  ;;  %v429_v47 = vsel %vm428_vm3, %v425_v43, %v427_v42  ;;  %v435_v51 = vmul.f32 %v427_v42, %v1822_v29 }
  0xfb   : > { %v434_v52 = vmul.f32 %v429_v47, %v1820_v28 }
  0xfc   : > { %439 = vrot.lane.b32.xlu1 %v433_v46, %s1554_s8  ;;  %1304 = vrot.lane.b32.xlu0 %v1303_v41, %s1556_s26 }
  0xfd   : > { %v472_v48 = vpop.permute.xlu1 %471  ;;  %v470_v49 = vpop.permute.xlu0 %469  ;;  %v1313_v61 = vpack.i.bf16 %v435_v51, %v434_v52 }
  0xfe   : > { %v477_v53 = vmul.f32 %v470_v49, %v1820_v28  ;;  %v473_v55 = vsel %vm445_vm4, %v470_v49, %v472_v48  ;;  %v479_v58 = vmul.f32 %v472_v48, %v458_v54 }
  0xff   : > { %v478_v59 = vmul.f32 %v473_v55, %v1822_v29 }
 0x100   : > { %483 = vrot.lane.b32.xlu1 %v477_v53, %s1553_s25  ;;  %1309 = vrot.lane.b32.xlu0 %v1308_v50, %s1555_s12 }
 0x101   : > { %v511_v56 = vpop.permute.xlu1 %510  ;;  %v509_v57 = vpop.permute.xlu0 %508  ;;  %v1323_v7 = vpack.i.bf16 %v479_v58, %v478_v59 }
 0x102   : > { %v516_v60 = vmul.f32 %v509_v57, %v1820_v28  ;;  %v512_v62 = vsel %vm404_vm5, %v509_v57, %v511_v56  ;;  %v518_v5 = vmul.f32 %v511_v56, %v458_v54 }
 0x103   : > { %v517_v6 = vmul.f32 %v512_v62, %v1822_v29 }
 0x104   : > { %1314 = vrot.lane.b32.xlu1 %v1313_v61, %s1554_s8  ;;  %522 = vrot.lane.b32.xlu0 %v516_v60, %s1551_s28 }
 0x105   : > { %v569_v0 = vpop.permute.xlu1 %568  ;;  %v567_v2 = vpop.permute.xlu0 %566  ;;  %v1328_v11 = vpack.i.bf16 %v518_v5, %v517_v6 }
 0x106   : > { %v570_v8 = vsel %vm295_vm0, %v567_v2, %v569_v0  ;;  %v574_v9 = vmul.f32 %v567_v2, %v1820_v28  ;;  %v576_v14 = vmul.f32 %v569_v0, %v458_v54 }
 0x107   : > { %v575_v10 = vmul.f32 %v570_v8, %v1822_v29 }
 0x108   : > { %1319 = vrot.lane.b32.xlu1 %v1318_v63, %s1558_s14  ;;  %1324 = vrot.lane.b32.xlu0 %v1323_v7, %s1553_s25 }
 0x109   : > { %v1333_v13 = vpack.i.bf16 %v575_v10, %v574_v9  ;;  %v1300_v15 = vpop.permute.xlu1 %1299 }
 0x10a   : > { %v1302_v19 = vunpack.i.h.bf16 %v1300_v15  ;;  %v1301_v20 = vunpack.i.l.bf16 %v1300_v15 }
 0x10c   : > { %540 = vrot.lane.b32.xlu1 %v1820_v28, %s1558_s14  ;;  %1329 = vrot.lane.b32.xlu0 %v1328_v11, %s1551_s28  ;;  %v364_v27 = vsel %vm362_vm6, %v1301_v20, %v1302_v19 }
 0x10d   : > { %v357_v17 = vpop.permute.xlu1 %356 }
 0x10e   : > { %v363_v25 = vsel %vm362_vm6, %v357_v17, %v1301_v20 }
 0x110   : > { %584 = vrot.lane.b32.xlu1 %v576_v14, %s1552_s15  ;;  %1334 = vrot.lane.b32.xlu0 %v1333_v13, %s1552_s15  ;;  %v592_v13 = vld [vmem:[%s2044_s3] sm:$0xf] }
 0x166   : > { %v339_v16 = vpop.permute.xlu0 %338 }
 0x16a   : > { %v399_v18 = vpop.permute.xlu0 %398 }
 0x16e   : > { %v440_v21 = vpop.permute.xlu1 %439  ;;  %v1305_v22 = vpop.permute.xlu0 %1304 }
 0x16f   : > { %v1307_v23 = vunpack.i.h.bf16 %v1305_v22  ;;  %v1306_v24 = vunpack.i.l.bf16 %v1305_v22  ;;  %v706_v22 = vld [vmem:[#allocation11] ss:$4 sm:$0x3] }
 0x171   : > { %v345_v26 = vsel %vm295_vm0, %v1306_v24, %v1307_v23  ;;  %v344_v30 = vsel %vm295_vm0, %v339_v16, %v1306_v24  ;;  %v715_v23 = vrot.slane %v706_v22, %v1795_v4  ;;  %v711_v24 = vrot.slane %v706_v22, %v1793_v3 }
 0x172   : > { %v484_v31 = vpop.permute.xlu1 %483  ;;  %v1310_v32 = vpop.permute.xlu0 %1309  ;;  %v612_v33 = vpack.c.bf16 %v364_v27, %v345_v26  ;;  %v611_v34 = vpack.c.bf16 %v363_v25, %v344_v30  ;;  %v763_v25 = vld [vmem:[#allocation11 + $0x2] ss:$4 sm:$0x3]  ;;  %v802_v30 = vld [vmem:[#allocation11] ss:$4 sm:$0x3] }
 0x173   : > { %v1312_v35 = vunpack.i.h.bf16 %v1310_v32  ;;  %v1311_v36 = vunpack.i.l.bf16 %v1310_v32  ;;  %v772_v26 = vrot.slane %v763_v25, %v1795_v4  ;;  %v768_v27 = vrot.slane %v763_v25, %v1793_v3 }
 0x174   : > { %632 = vmatprep.subr.bf16.mxu0 %v612_v33  ;;  %v807_v32 = vrot.slane %v802_v30, %v1793_v3  ;;  %v845_v33 = vld [vmem:[#allocation11 + $0x2] ss:$4 sm:$0x3] }
 0x175   : > { %633 = vmatpush1.bf16.msra.mxu0 %v611_v34  ;;  %v406_v41 = vsel %vm404_vm5, %v1311_v36, %v1312_v35  ;;  %v405_v43 = vsel %vm404_vm5, %v399_v18, %v1311_v36  ;;  %v854_v34 = vrot.slane %v845_v33, %v1795_v4  ;;  %v850_v35 = vrot.slane %v845_v33, %v1793_v3  ;;  %v884_v36 = vld [vmem:[#allocation11] ss:$4 sm:$0x3] }
 0x176   : > { %v1315_v37 = vpop.permute.xlu1 %1314  ;;  %v523_v38 = vpop.permute.xlu0 %522 }
 0x177   : > { %v1317_v39 = vunpack.i.h.bf16 %v1315_v37  ;;  %v1316_v40 = vunpack.i.l.bf16 %v1315_v37  ;;  %v893_v37 = vrot.slane %v884_v36, %v1795_v4 }
 0x179   : > { %v447_v42 = vsel %vm445_vm4, %v1316_v40, %v1317_v39  ;;  %v446_v44 = vsel %vm445_vm4, %v440_v21, %v1316_v40  ;;  %v941_v39 = vld [vmem:[#allocation11 + $0x2] ss:$4 sm:$0x3] }
 0x17a   : > { %v1320_v45 = vpop.permute.xlu1 %1319  ;;  %v1325_v46 = vpop.permute.xlu0 %1324  ;;  %v614_v47 = vpack.c.bf16 %v447_v42, %v406_v41  ;;  %v613_v48 = vpack.c.bf16 %v446_v44, %v405_v43  ;;  %v950_v40 = vrot.slane %v941_v39, %v1795_v4  ;;  %v946_v41 = vrot.slane %v941_v39, %v1793_v3 }
 0x17b   : > { %v1327_v49 = vunpack.i.h.bf16 %v1325_v46  ;;  %v1326_v50 = vunpack.i.l.bf16 %v1325_v46  ;;  %v1322_v51 = vunpack.i.h.bf16 %v1320_v45  ;;  %v1321_v52 = vunpack.i.l.bf16 %v1320_v45 }
 0x17c   : > { %634 = vmatprep.subr.bf16.mxu0 %v614_v47 }
 0x17d   : > { %635 = vmatpush1.bf16.msra.mxu0 %v613_v48  ;;  %v490_v53 = vsel %vm428_vm3, %v1326_v50, %v1327_v49  ;;  %v489_v54 = vsel %vm428_vm3, %v484_v31, %v1326_v50  ;;  %v548_v63 = vsel %vm546_vm7, %v1321_v52, %v1322_v51  ;;  %v811_v31 = vrot.slane %v802_v30, %v1795_v4 }
 0x17e   : > { %v541_v55 = vpop.permute.xlu1 %540  ;;  %v1330_v56 = vpop.permute.xlu0 %1329  ;;  %v616_v57 = vpack.c.bf16 %v490_v53, %v1822_v29  ;;  %v615_v58 = vpack.c.bf16 %v489_v54, %v1820_v28 }
 0x17f   : > { %v1332_v59 = vunpack.i.h.bf16 %v1330_v56  ;;  %v1331_v60 = vunpack.i.l.bf16 %v1330_v56  ;;  %v547_v61 = vsel %vm546_vm7, %v541_v55, %v1321_v52 }
 0x180   : > { %636 = vmatprep.subr.bf16.mxu0 %v616_v57 }
 0x181   : > { %637 = vmatpush1.bf16.msra.mxu0 %v615_v58  ;;  %v529_v62 = vsel %vm387_vm2, %v1331_v60, %v1332_v59  ;;  %v528_v0 = vsel %vm387_vm2, %v523_v38, %v1331_v60  ;;  %v889_v38 = vrot.slane %v884_v36, %v1793_v3 }
 0x182   : > { %v1335_v2 = vpop.permute.xlu0 %1334  ;;  %v618_v5 = vpack.c.bf16 %v548_v63, %v529_v62  ;;  %v617_v6 = vpack.c.bf16 %v547_v61, %v528_v0  ;;  %v585_v29 = vpop.permute.xlu1 %584 }
 0x183   : > { %v1337_v7 = vunpack.i.h.bf16 %v1335_v2  ;;  %v1336_v8 = vunpack.i.l.bf16 %v1335_v2 }
 0x184   : > { %638 = vmatprep.subr.bf16.mxu0 %v618_v5 }
 0x185   : > { %v587_v28 = vsel %vm327_vm1, %v1337_v7, %v585_v29  ;;  %639 = vmatpush1.bf16.msra.mxu0 %v617_v6  ;;  %v586_v9 = vsel %vm327_vm1, %v1336_v8, %v1337_v7 }
 0x186   : > { %v620_v10 = vpack.c.bf16 %v587_v28, %v587_v28  ;;  %v619_v11 = vpack.c.bf16 %v586_v9, %v586_v9  ;;  %v844_v9 = vld [vmem:[#allocation4 + $0x18] sm:$0xff] }
 0x188   : > { %1214 = vmatprep.subr.msk.bf16.mxu0 %vm625_vm8, %v620_v10  ;;  %v627_v12 = vsel %vm625_vm8, %v619_v11, 0 }
 0x189   : > { %641 = vmatpush1.bf16.msra.mxu0 %v627_v12 }
 0x18c   : > { %1215 = vmatmul.mubr.msk.bf16.vlgmr.msra.gmra.mrb[0].mxu0 %vm621_vm9, %v592_v13 }
 0x25f   : > { %v1889_v14 = vpop.f32.mrb[0].mxu0 }
 0x260   : > { %v1891_v15 = vpop.f32.mrb[1].mxu0  ;;  %v677_v16 = vmul.f32 %v1889_v14, %v1889_v14 }
 0x261   : > { %v670_v17 = vpop.f32.mrb[2].mxu0  ;;  %v673_v18 = vadd.f32 %v1891_v15, %v1889_v14  ;;  %v678_v19 = vmul.f32 %v1891_v15, %v1891_v15 }
 0x262   : > { %v671_v20 = vpop.f32.mrb[3].mxu0 }
 0x263   : > { %674 = vadd.xlane.f32.xlu0 %v673_v18  ;;  %v679_v21 = vadd.f32 %v678_v19, %v677_v16 }
 0x265   : > { %680 = vadd.xlane.f32.xlu1 %v679_v21 }
 0x276   : > { %718 = vrot.lane.b32.xlu1 %v715_v23, %s1552_s15 }
 0x279   : > { %716 = vrot.lane.b32.xlu0 %v711_v24, %s1552_s15 }
 0x27a   : > { %775 = vrot.lane.b32.xlu1 %v772_v26, %s1551_s28 }
 0x27d   : > { %773 = vrot.lane.b32.xlu0 %v768_v27, %s1551_s28 }
 0x27e   : > { %814 = vrot.lane.b32.xlu1 %v811_v31, %s1553_s25 }
 0x281   : > { %812 = vrot.lane.b32.xlu0 %v807_v32, %s1553_s25 }
 0x282   : > { %857 = vrot.lane.b32.xlu1 %v854_v34, %s1554_s8 }
 0x285   : > { %855 = vrot.lane.b32.xlu0 %v850_v35, %s1554_s8 }
 0x286   : > { %896 = vrot.lane.b32.xlu1 %v893_v37, %s1555_s12 }
 0x289   : > { %894 = vrot.lane.b32.xlu0 %v889_v38, %s1555_s12 }
 0x28a   : > { %953 = vrot.lane.b32.xlu1 %v950_v40, %s1556_s26 }
 0x28d   : > { %951 = vrot.lane.b32.xlu0 %v946_v41, %s1556_s26 }
 0x28e   : > { %748 = vrot.lane.b32.xlu1 %v1550_v1, %s1557_s7 }
 0x2f0   : > { %v675_v42 = vpop.xlane.xlu0 %674 }
 0x2f1   : > { %v676_v43 = vmul.f32 0.00390625, %v675_v42 }
 0x2f2   : > { %v681_v44 = vpop.xlane.xlu1 %680 }
 0x2f3   : > { %v682_v45 = vmul.f32 0.00390625, %v681_v44  ;;  %v683_v46 = vmul.f32 %v676_v43, %v676_v43  ;;  %v685_v54 = vsub.f32 %v1889_v14, %v676_v43  ;;  %v686_v55 = vsub.f32 %v1891_v15, %v676_v43 }
 0x2f4   : > { %v717_v47 = vpop.permute.xlu0 %716 }
 0x2f5   : > { %v684_v48 = vsub.f32 %v682_v45, %v683_v46  ;;  %v724_v49 = vmul.f32 0.0, %v717_v47 }
 0x2f6   : > { %v719_v4 = vpop.permute.xlu1 %718 }
 0x2f7   : > { %v687_v50 = vadd.f32 1e-05, %v684_v48  ;;  %730 = vrot.lane.b32.xlu0 %v724_v49, %s1556_s26  ;;  %v720_v0 = vsel %vm327_vm1, %v717_v47, %v719_v4 }
 0x2f8   : > { %v774_v3 = vpop.permute.xlu0 %773 }
 0x2f9   : > { %1379 = vrsqrt.f32 %v687_v50  ;;  %v781_v51 = vmul.f32 0.0, %v774_v3 }
 0x2fa   : > { %v776_v52 = vpop.permute.xlu1 %775 }
 0x2fb   : > { %787 = vrot.lane.b32.xlu0 %v781_v51, %s1555_s12  ;;  %v777_v8 = vsel %vm387_vm2, %v774_v3, %v776_v52 }
 0x2fc   : > { %v813_v53 = vpop.permute.xlu0 %812 }
 0x2fd   : > { %v820_v1 = vmul.f32 0.0, %v813_v53 }
 0x2fe   : > { %v815_v56 = vpop.permute.xlu1 %814 }
 0x2ff   : > { %826 = vrot.lane.b32.xlu1 %v820_v1, %s1554_s8  ;;  %v816_v12 = vsel %vm428_vm3, %v813_v53, %v815_v56 }
 0x300   : > { %v856_v7 = vpop.permute.xlu0 %855 }
 0x302   : > { %v858_v2 = vpop.permute.xlu1 %857 }
 0x303   : > { %v1380_v57 = vpop.eup %1379  ;;  %v859_v13 = vsel %vm445_vm4, %v856_v7, %v858_v2  ;;  %v865_v16 = vmul.f32 %v858_v2, %v844_v9 }
 0x304   : > { %v689_v58 = vmul.f32 %v1380_v57, %v685_v54  ;;  %v690_v59 = vmul.f32 %v1380_v57, %v686_v55  ;;  %v895_v19 = vpop.permute.xlu0 %894 }
 0x306   : > { %vm691_vm10 = vcmp.ge.f32.partialorder %v689_v58, 0.0  ;;  %vm692_vm11 = vcmp.ge.f32.partialorder %v690_v59, 0.0  ;;  %v693_v60 = vmul.f32 0.2, %v689_v58  ;;  %v694_v61 = vmul.f32 0.2, %v690_v59  ;;  %v897_v14 = vpop.permute.xlu1 %896 }
 0x307   : > { %v898_v22 = vsel %vm404_vm5, %v895_v19, %v897_v14  ;;  %v904_v23 = vmul.f32 %v897_v14, %v844_v9 }
 0x308   : > { %v1930_v62 = vsel %vm691_vm10, %v689_v58, %v693_v60  ;;  %v1932_v63 = vsel %vm692_vm11, %v690_v59, %v694_v61  ;;  %v952_v31 = vpop.permute.xlu0 %951 }
 0x309   : > { %v726_v5 = vmul.f32 %v719_v4, %v1932_v63  ;;  %v725_v6 = vmul.f32 %v720_v0, %v1930_v62  ;;  %v783_v29 = vmul.f32 %v776_v52, %v1932_v63  ;;  %v782_v28 = vmul.f32 %v777_v8, %v1930_v62 }
 0x30a   : > { %v1338_v10 = vpack.i.bf16 %v1932_v63, %v1930_v62  ;;  %v822_v15 = vmul.f32 %v815_v56, %v1932_v63  ;;  %v821_v17 = vmul.f32 %v816_v12, %v1930_v62  ;;  %v864_v18 = vmul.f32 %v859_v13, %v1932_v63  ;;  %v954_v27 = vpop.permute.xlu1 %953 }
 0x30b   : > { %v1348_v11 = vpack.i.bf16 %v726_v5, %v725_v6  ;;  %v1343_v20 = vpack.i.bf16 %v844_v9, %v1932_v63  ;;  %v1353_v21 = vpack.i.bf16 %v783_v29, %v782_v28  ;;  %v903_v24 = vmul.f32 %v898_v22, %v1932_v63 }
 0x30c   : > { %1339 = vrot.lane.b32.xlu1 %v1338_v10, %s1557_s7  ;;  %v1358_v25 = vpack.i.bf16 %v822_v15, %v821_v17  ;;  %v1363_v26 = vpack.i.bf16 %v865_v16, %v864_v18  ;;  %v863_v30 = vmul.f32 %v856_v7, %v1930_v62  ;;  %v955_v33 = vsel %vm295_vm0, %v952_v31, %v954_v27 }
 0x30d   : > { %1349 = vrot.lane.b32.xlu0 %v1348_v11, %s1556_s26  ;;  %v1368_v32 = vpack.i.bf16 %v904_v23, %v903_v24  ;;  %v902_v34 = vmul.f32 %v895_v19, %v1930_v62  ;;  %v960_v35 = vmul.f32 %v955_v33, %v1932_v63  ;;  %v961_v36 = vmul.f32 %v954_v27, %v844_v9 }
 0x30e   : > { %v959_v37 = vmul.f32 %v952_v31, %v1930_v62  ;;  %v749_v39 = vpop.permute.xlu1 %748 }
 0x310   : > { %1344 = vrot.lane.b32.xlu1 %v1343_v20, %s1558_s14  ;;  %v1373_v38 = vpack.i.bf16 %v960_v35, %v959_v37 }
 0x311   : > { %1354 = vrot.lane.b32.xlu0 %v1353_v21, %s1555_s12  ;;  %s1560_s12 = smov [#allocation12]  }
 0x312   : > { %s1475_s26 = sshll.u32 %s1560_s12, 4  ;;  %s1476_s26 = int_to_ptr.vmem [resolvable:$false] %s1475_s26 }
 0x313   : > { %s1477_s7 = scalar_lea.vmem %s1476_s26, 512  ;;  %p1478_p2 = scmp.lt.s32.totalorder %s1999_s23, %s1476_s26 }
 0x314   : > { %1359 = vrot.lane.b32.xlu1 %v1358_v25, %s1554_s8  ;;  %s1471_s8 = scalar_lea.vmem %s1999_s23, 256 }
 0x315   : > { %1364 = vrot.lane.b32.xlu0 %v1363_v26, %s1553_s25  ;;  %p1472_p3 = scmp.ne.s32.totalorder %s1999_s23, %s1471_s8  ;;  %p1479_p7 = scmp.lt.s32.totalorder %s1477_s7, %s1471_s8 }
 0x317   : > { %p1473_p10 = pnand %p1472_p3, %p2067_p5  ;;  %p1480_p4 = por %p1479_p7, %p1478_p2 }
 0x318   : > { %869 = vrot.lane.b32.xlu1 %v863_v30, %s1553_s25  ;;  %s1997_s25 = scalar_lea.hbm %s2046_s5, %s1225_s10 }
 0x319   : > { %1369 = vrot.lane.b32.xlu0 %v1368_v32, %s1551_s28  ;;  %p1474_p12 = pneg %p1473_p10 }
 0x31b   : > { %p1481_p8 = pnand %p1480_p4, %p1474_p12 }
 0x31c   : > { %926 = vrot.lane.b32.xlu1 %v1930_v62, %s1558_s14 }
 0x31d   : > { %908 = vrot.lane.b32.xlu0 %v902_v34, %s1551_s28  ;;  %v977_v34 = vld [vmem:[%s2045_s4] sm:$0xf] }
 0x320   : > { %969 = vrot.lane.b32.xlu1 %v961_v36, %s1552_s15 }
 0x321   : > { %1374 = vrot.lane.b32.xlu0 %v1373_v38, %s1552_s15 }
 0x369   : > { %v731_v40 = vpop.permute.xlu0 %730 }
 0x36d   : > { %v788_v42 = vpop.permute.xlu0 %787 }
 0x371   : > { %v827_v41 = vpop.permute.xlu1 %826 }
 0x37e   : > { %v1340_v43 = vpop.permute.xlu1 %1339 }
 0x37f   : > { %v1350_v44 = vpop.permute.xlu0 %1349  ;;  %v1342_v45 = vunpack.i.h.bf16 %v1340_v43  ;;  %v1341_v46 = vunpack.i.l.bf16 %v1340_v43 }
 0x380   : > { %v1352_v47 = vunpack.i.h.bf16 %v1350_v44  ;;  %v1351_v48 = vunpack.i.l.bf16 %v1350_v44 }
 0x381   : > { %v755_v4 = vsel %vm362_vm6, %v1341_v46, %v1342_v45  ;;  %v754_v3 = vsel %vm362_vm6, %v749_v39, %v1341_v46 }
 0x382   : > { %v737_v49 = vsel %vm295_vm0, %v1351_v48, %v1352_v47  ;;  %v736_v50 = vsel %vm295_vm0, %v731_v40, %v1351_v48  ;;  %v1345_v51 = vpop.permute.xlu1 %1344 }
 0x383   : > { %v1355_v52 = vpop.permute.xlu0 %1354  ;;  %v997_v53 = vpack.c.bf16 %v755_v4, %v737_v49  ;;  %v996_v1 = vpack.c.bf16 %v754_v3, %v736_v50  ;;  %v1347_v0 = vunpack.i.h.bf16 %v1345_v51  ;;  %v1346_v2 = vunpack.i.l.bf16 %v1345_v51 }
 0x384   : > { %v1357_v54 = vunpack.i.h.bf16 %v1355_v52  ;;  %v1356_v55 = vunpack.i.l.bf16 %v1355_v52 }
 0x385   : > { %1015 = vmatprep.subr.bf16.mxu1 %v997_v53  ;;  %v933_v17 = vsel %vm546_vm7, %v1346_v2, %v1347_v0 }
 0x386   : > { %1016 = vmatpush1.bf16.msra.mxu1 %v996_v1  ;;  %v1360_v56 = vpop.permute.xlu1 %1359  ;;  %v794_v5 = vsel %vm404_vm5, %v1356_v55, %v1357_v54  ;;  %v793_v7 = vsel %vm404_vm5, %v788_v42, %v1356_v55 }
 0x387   : > { %v1365_v57 = vpop.permute.xlu0 %1364  ;;  %v1362_v58 = vunpack.i.h.bf16 %v1360_v56  ;;  %v1361_v59 = vunpack.i.l.bf16 %v1360_v56 }
 0x388   : > { %v1367_v60 = vunpack.i.h.bf16 %v1365_v57  ;;  %v1366_v61 = vunpack.i.l.bf16 %v1365_v57 }
 0x389   : > { %v833_v6 = vsel %vm445_vm4, %v1361_v59, %v1362_v58  ;;  %v832_v8 = vsel %vm445_vm4, %v827_v41, %v1361_v59 }
 0x38a   : > { %v876_v29 = vsel %vm428_vm3, %v1366_v61, %v1367_v60  ;;  %v870_v28 = vpop.permute.xlu1 %869  ;;  %v999_v10 = vpack.c.bf16 %v833_v6, %v794_v5  ;;  %v998_v11 = vpack.c.bf16 %v832_v8, %v793_v7 }
 0x38b   : > { %v1370_v9 = vpop.permute.xlu0 %1369  ;;  %v1001_v12 = vpack.c.bf16 %v876_v29, %v1932_v63  ;;  %v875_v15 = vsel %vm428_vm3, %v870_v28, %v1366_v61 }
 0x38c   : > { %v1372_v13 = vunpack.i.h.bf16 %v1370_v9  ;;  %v1371_v14 = vunpack.i.l.bf16 %v1370_v9  ;;  %1017 = vmatprep.subr.bf16.mxu1 %v999_v10  ;;  %v1000_v21 = vpack.c.bf16 %v875_v15, %v1930_v62 }
 0x38d   : > { %1018 = vmatpush1.bf16.msra.mxu1 %v998_v11 }
 0x38e   : > { %v915_v16 = vsel %vm387_vm2, %v1371_v14, %v1372_v13  ;;  %v927_v18 = vpop.permute.xlu1 %926  ;;  %1019 = vmatprep.subr.bf16.mxu1 %v1001_v12 }
 0x38f   : > { %v909_v19 = vpop.permute.xlu0 %908  ;;  %v1003_v20 = vpack.c.bf16 %v933_v17, %v915_v16  ;;  %v932_v63 = vsel %vm546_vm7, %v927_v18, %v1346_v2 }
 0x390   : > { %v914_v22 = vsel %vm387_vm2, %v909_v19, %v1371_v14 }
 0x391   : > { %v1002_v23 = vpack.c.bf16 %v932_v63, %v914_v22  ;;  %1020 = vmatpush1.bf16.msra.mxu1 %v1000_v21 }
 0x392   : > { %1021 = vmatprep.subr.bf16.mxu1 %v1003_v20  ;;  %v970_v27 = vpop.permute.xlu1 %969 }
 0x393   : > { %v1375_v24 = vpop.permute.xlu0 %1374 }
 0x394   : > { %v1377_v25 = vunpack.i.h.bf16 %v1375_v24  ;;  %v1376_v26 = vunpack.i.l.bf16 %v1375_v24 }
 0x395   : > { %1022 = vmatpush1.bf16.msra.mxu1 %v1002_v23 }
 0x396   : > { %v972_v30 = vsel %vm327_vm1, %v1377_v25, %v970_v27  ;;  %v971_v31 = vsel %vm327_vm1, %v1376_v26, %v1377_v25 }
 0x397   : > { %v1005_v32 = vpack.c.bf16 %v972_v30, %v972_v30  ;;  %v1004_v33 = vpack.c.bf16 %v971_v31, %v971_v31 }
 0x399   : > { %1216 = vmatprep.subr.msk.bf16.mxu1 %vm625_vm8, %v1005_v32  ;;  %v1010_v62 = vsel %vm625_vm8, %v1004_v33, 0 }
 0x39a   : > { %1024 = vmatpush1.bf16.msra.mxu1 %v1010_v62 }
 0x39d   : > { %1217 = vmatmul.mubr.msk.bf16.vlgmr.msra.gmra.mrb[0].mxu1 %vm621_vm9, %v977_v34 }
 0x470   : > { %v1049_v35 = vpop.f32.mrb[0].mxu1 }
 0x471   : > { %v1051_v36 = vpop.f32.mrb[1].mxu1  ;;  %v1060_v37 = vmul.f32 %v1049_v35, %v1049_v35 }
 0x472   : > { %v1053_v38 = vpop.f32.mrb[2].mxu1  ;;  %v1056_v39 = vadd.f32 %v1051_v36, %v1049_v35  ;;  %v1061_v40 = vmul.f32 %v1051_v36, %v1051_v36 }
 0x473   : > { %v1054_v41 = vpop.f32.mrb[3].mxu1 }
 0x474   : > { %1057 = vadd.xlane.f32.xlu0 %v1056_v39  ;;  %v1062_v42 = vadd.f32 %v1061_v40, %v1060_v37 }
 0x476   : > { %1063 = vadd.xlane.f32.xlu1 %v1062_v42 }
 0x501   : > { %v1058_v43 = vpop.xlane.xlu0 %1057 }
 0x502   : > { %v1059_v44 = vmul.f32 0.00390625, %v1058_v43 }
 0x503   : > { %v1064_v45 = vpop.xlane.xlu1 %1063 }
 0x504   : > { %v1065_v46 = vmul.f32 0.00390625, %v1064_v45  ;;  %v1066_v47 = vmul.f32 %v1059_v44, %v1059_v44  ;;  %v1068_v4 = vsub.f32 %v1049_v35, %v1059_v44  ;;  %v1069_v50 = vsub.f32 %v1051_v36, %v1059_v44 }
 0x506   : > { %v1067_v48 = vsub.f32 %v1065_v46, %v1066_v47 }
 0x508   : > { %v1070_v49 = vadd.f32 1e-05, %v1067_v48 }
 0x50a   : > { %1381 = vrsqrt.f32 %v1070_v49 }
 0x514   : > { %v1382_v3 = vpop.eup %1381 }
 0x515   : > { %v1072_v51 = vmul.f32 %v1382_v3, %v1068_v4  ;;  %v1073_v52 = vmul.f32 %v1382_v3, %v1069_v50 }
 0x517   : > { %vm1074_vm12 = vcmp.ge.f32.partialorder %v1072_v51, 0.0  ;;  %vm1075_vm13 = vcmp.ge.f32.partialorder %v1073_v52, 0.0  ;;  %v1076_v53 = vmul.f32 0.2, %v1072_v51  ;;  %v1077_v1 = vmul.f32 0.2, %v1073_v52 }
 0x519   : > { %v1078_v54 = vsel %vm1074_vm12, %v1072_v51, %v1076_v53  ;;  %v1079_v55 = vsel %vm1075_vm13, %v1073_v52, %v1077_v1 }
 0x51a   : > { %1080 = vst [vmem:[%s290_s17] sm:$0xff] %v1078_v54  ;;  %1081 = vst [vmem:[%s290_s17 + $0x8] sm:$0xff] %v1079_v55 }
 0x51b   : > { %1484 = shalt.err (!%p1481_p8)
}
 0x51c   : > { %s1485_s0 = scalar_lea.hbm %s1997_s25, 256  ;;  %s1489_s11 = scalar_lea.hbm %s2046_s5, 512 }
 0x51d   : > { %p1486_p0 = scmp.ne.s32.totalorder %s1997_s25, %s1485_s0  ;;  %p1490_p11 = scmp.lt.u32.totalorder %s1997_s25, %s2046_s5 }
 0x51e   : > { %p1491_p6 = scmp.lt.u32.totalorder %s1489_s11, %s1485_s0  ;;  %p1493_p3 = scmp.lt.u32.totalorder %s1485_s0, %s1997_s25 }
 0x51f   : > { %p1487_p13 = pnand %p1486_p0, %p2067_p5 }
 0x520   : > { %p1492_p1 = por %p1491_p6, %p1490_p11 }
 0x521   : > { %p1488_p9 = pneg %p1487_p13 }
 0x522   : > { %p1494_p10 = por %p1493_p3, %p1492_p1 }
 0x524   : > { %p1495_p12 = pnand %p1494_p10, %p1488_p9 }
 0x526   : > { %1498 = shalt.err (!%p1495_p12)
}
 0x527   : > { %1234 = dma.vmem_to_hbm [thread:$0]  (%p2067_p5), %s1999_s23, 256, %s1997_s25, %s1083_s22  }
 0x528 PF: > { %s1109_s6 = sand.u32 1, %s1533_s18   ;;  %p2068_p2 = scmp.ne.s32.totalorder %s2054_s30, 0 }
 0x529   : > { %p2069_p7 = scmp.ge.s32.totalorder %s1545_s21, 2  ;;  %s1110_s10 = scalar_lea.sflag [#allocation8], %s1109_s6 }
 0x52b   : > { %p1248_p4 = pnand %p2069_p7, %p2068_p2 }
 0x52d   : > { %1528 = dma.done.wait (!%p1248_p4), %s1110_s10, 256  }
 0x52e   : > { %1530 = vsyncadd (!%p1248_p4), %s1110_s10, 4294967040  ;;  %p21_p8 = scmp.ge.s32.totalorder %s1616_s24, 4   ;;  %s2070_s18 = smov %s1537_s19 }
 0x52f   : > { %s2071_s19 = smov %s1541_s20  ;;  %s2072_s20 = smov %s1628_s27 }
 0x530   : > { %s2073_s21 = smov %s1616_s24  ;;  %23 = sbr.rel (!%p21_p8) target bundleno = 9 (0x9), region = 103 }
 0x537   :  { %1115 = vsyncpa [#allocation7], 1 }
 0x538   :  { %1117 = vsyncpa [#allocation7 + $0x1], 1 }
 0x539   :  { %1118 = vsyncpa [#allocation10], 1 }
 0x53a   :  { %1120 = vsyncpa [#allocation10 + $0x1], 1 }
 0x53b   :  { %1121 = vsyncpa [#allocation8], 1 }
 0x53c   :  { %1123 = vsyncpa [#allocation8 + $0x1], 1 }

</bundles_post_ra>
